<compile_context>
chip_gen: v7x
topology: tpu7x:2x2x1
jax: 0.10.0
libtpu: 0.0.40
codegen_flags: <defaults>
</compile_context>

<pallas_src>
import functools

import jax
import jax.numpy as jnp
from jax import lax
from jax.experimental import pallas as pl
from jax.experimental.pallas import tpu as pltpu


def _lstm_fc_kernel(x_ref, wih_ref, whh_ref, b_ref, wfc_ref, bfc_ref,
                    out_ref, h_ref, c_ref, xw_ref, hs_ref, *,
                    batch_pad, time_block):
    """One time-chunk of the fused LSTM + Linear.

    x_ref   : (rows, I)    compute dtype, time-major rows (row = t*B_pad + b)
    wih_ref : (I, 4H)      compute dtype, gate columns ordered (i, f, o, g)
    whh_ref : (H, 4H)      compute dtype, gate columns ordered (i, f, o, g)
    b_ref   : (1, 4H)      f32, fused bias (b_ih + b_hh), same gate order
    wfc_ref : (H, Dp)      compute dtype, fc weight zero-padded to Dp lanes
    bfc_ref : (1, Dp)      f32
    out_ref : (rows, Dp)   f32
    h_ref, c_ref : (B_pad, H) f32 scratch, persist across grid steps
    xw_ref  : (rows, 4H)   f32 scratch, hoisted input projection
    hs_ref  : (rows, H)    compute-dtype scratch, hidden states of the chunk
    """
    B = batch_pad
    H = h_ref.shape[1]

    # Initialise the recurrent state only on the first time chunk.
    @pl.when(pl.program_id(0) == 0)
    def _init():
        h_ref[...] = jnp.zeros(h_ref.shape, h_ref.dtype)
        c_ref[...] = jnp.zeros(c_ref.shape, c_ref.dtype)

    # (1) Hoisted input projection + fused bias: ONE MXU matmul per chunk.
    xw_ref[...] = (
        jnp.dot(x_ref[...], wih_ref[...], preferred_element_type=jnp.float32)
        + b_ref[...])

    whh = whh_ref[...]

    # (2) Sequential recurrence: only the unavoidable h @ W_hh per step.
    def step(j, carry):
        r = pl.multiple_of(j * B, 8)            # 8-aligned -> unmasked sublane tiles
        xw_t = xw_ref[pl.ds(r, B), :]           # (B_pad, 4H) f32
        h = h_ref[...]
        c = c_ref[...]

        gates = xw_t + jnp.dot(h.astype(whh.dtype), whh,
                               preferred_element_type=jnp.float32)

        # Gate order is (i, f, o, g): one wide sigmoid + one tanh per step.
        sig = jax.nn.sigmoid(gates[:, :3 * H])
        g_g = jnp.tanh(gates[:, 3 * H:])
        i_g = sig[:, 0 * H:1 * H]
        f_g = sig[:, 1 * H:2 * H]
        o_g = sig[:, 2 * H:3 * H]

        c_new = f_g * c + i_g * g_g
        h_new = o_g * jnp.tanh(c_new)

        c_ref[...] = c_new
        h_ref[...] = h_new
        hs_ref[pl.ds(r, B), :] = h_new.astype(hs_ref.dtype)
        return carry

    # Capped unroll: overlap step t+1's matmul with step t's gate math without
    # exceeding the 64-vreg budget when time_block is large.
    lax.fori_loop(0, time_block, step, 0, unroll=min(time_block, 8))

    # (3) Hoisted fc: ONE (rows, H) @ (H, Dp) matmul + one lane-dense store.
    out_ref[...] = (
        jnp.dot(hs_ref[...], wfc_ref[...], preferred_element_type=jnp.float32)
        + bfc_ref[...])


def _pick_time_block(T, batch_pad, input_size, hidden, dense_pad,
                     compute_itemsize, vmem_budget_bytes):
    """Largest divisor of T whose per-chunk VMEM footprint fits the budget."""
    per_row = (2 * input_size * compute_itemsize     # x (double-buffered)
               + 4 * hidden * 4                      # xw scratch (f32)
               + hidden * compute_itemsize           # hs scratch
               + 2 * dense_pad * 4)                  # out (double-buffered, f32)
    max_block = max(1, int(vmem_budget_bytes // (per_row * batch_pad)))
    best = 1
    for cand in range(1, T + 1):
        if T % cand == 0 and cand <= max_block:
            best = cand
    return best


def lstm_model_forward(x, kernel_params, dense_units, *, time_block=None,
                       compute_dtype=jnp.bfloat16,
                       vmem_budget_bytes=24 * 1024 * 1024):
    """x: (B, T, input_size) f32 (batch_first, like PyTorch).

    Returns (B, T, dense_units) f32.
    """
    wih_t, whh_t, b, wfc_t, bfc = kernel_params
    B, T, I = x.shape
    H = whh_t.shape[0]
    Dp = wfc_t.shape[1]
    D = dense_units

    # Pad batch to a multiple of 8 sublanes: per-step accesses become whole,
    # 8-aligned tiles (no masked sublane loads/stores on the recurrence path).
    B_pad = ((B + 7) // 8) * 8
    if B_pad != B:
        x = jnp.pad(x, ((0, B_pad - B), (0, 0), (0, 0)))

    c_itemsize = jnp.dtype(compute_dtype).itemsize
    if time_block is None:
        time_block = _pick_time_block(T, B_pad, I, H, Dp, c_itemsize,
                                      vmem_budget_bytes)
    assert T % time_block == 0, "time_block must divide T"
    n_chunks = T // time_block
    rows = time_block * B_pad

    # MXU operands in compute dtype (bf16 recommended on v6e/v7x); biases f32.
    wih_c = wih_t.astype(compute_dtype)
    whh_c = whh_t.astype(compute_dtype)
    wfc_c = wfc_t.astype(compute_dtype)
    b_f32 = b.astype(jnp.float32)
    bfc_f32 = bfc.astype(jnp.float32)

    # Time-major flatten once in XLA (row = t*B_pad + b): keeps every in-kernel
    # matmul strictly 2-D and every per-step access a whole aligned tile.
    x2d = jnp.transpose(x.astype(compute_dtype), (1, 0, 2)).reshape(T * B_pad, I)

    kernel = functools.partial(_lstm_fc_kernel, batch_pad=B_pad,
                               time_block=time_block)

    # NOTE: the five pinned specs (index_map -> (0,0)) could additionally use
    # pipeline_mode=pl.Buffered(1) to halve their VMEM reservation at large H.
    # TODO(synk): on v7x, add a second "parallel" grid axis over batch shards
    # (or pl.core_map over the 2 TensorCores) with per-shard h/c scratch.
    out2d = pl.pallas_call(
        kernel,
        out_shape=jax.ShapeDtypeStruct((T * B_pad, Dp), jnp.float32),
        grid_spec=pltpu.PrefetchScalarGridSpec(
            num_scalar_prefetch=0,
            grid=(n_chunks,),
            in_specs=[
                pl.BlockSpec((rows, I), lambda t: (t, 0)),       # x chunk
                pl.BlockSpec((I, 4 * H), lambda t: (0, 0)),      # W_ih (pinned)
                pl.BlockSpec((H, 4 * H), lambda t: (0, 0)),      # W_hh (pinned)
                pl.BlockSpec((1, 4 * H), lambda t: (0, 0)),      # fused bias
                pl.BlockSpec((H, Dp), lambda t: (0, 0)),         # W_fc (pinned)
                pl.BlockSpec((1, Dp), lambda t: (0, 0)),         # fc bias
            ],
            out_specs=pl.BlockSpec((rows, Dp), lambda t: (t, 0)),
            scratch_shapes=[
                pltpu.VMEM((B_pad, H), jnp.float32),             # h state
                pltpu.VMEM((B_pad, H), jnp.float32),             # c state
                pltpu.VMEM((rows, 4 * H), jnp.float32),          # hoisted x@W_ih + b
                pltpu.VMEM((rows, H), compute_dtype),            # chunk hidden states
            ]),
        compiler_params=pltpu.CompilerParams(
            dimension_semantics=("arbitrary",),                  # sequential over time
            vmem_limit_bytes=48 * 1024 * 1024),
    )(x2d, wih_c, whh_c, b_f32, wfc_c, bfc_f32)

    # (T*B_pad, Dp) -> (B, T, D), dropping batch/lane padding (batch_first).
    out = jnp.transpose(out2d.reshape(T, B_pad, Dp), (1, 0, 2))
    return out[:B, :, :D]


def init_params(key, input_size, hidden_units, dense_units):
    """Canonical PyTorch-shaped parameters (gate order i, f, g, o)."""
    k = jax.random.split(key, 6)
    H, I, D = hidden_units, input_size, dense_units
    s = 1.0 / jnp.sqrt(jnp.float32(H))
    w_ih = jax.random.uniform(k[0], (4 * H, I), jnp.float32, -s, s)   # weight_ih_l0
    w_hh = jax.random.uniform(k[1], (4 * H, H), jnp.float32, -s, s)   # weight_hh_l0
    b_ih = jax.random.uniform(k[2], (4 * H,), jnp.float32, -s, s)
    b_hh = jax.random.uniform(k[3], (4 * H,), jnp.float32, -s, s)
    w_fc = jax.random.uniform(k[4], (D, H), jnp.float32, -s, s)       # fc.weight
    b_fc = jax.random.uniform(k[5], (D,), jnp.float32, -s, s)
    return w_ih, w_hh, b_ih, b_hh, w_fc, b_fc


def _reorder_gates_last_axis(a):
    """(..., 4H) gate-major (i, f, g, o) -> (i, f, o, g)."""
    i, f, g, o = jnp.split(a, 4, axis=-1)
    return jnp.concatenate([i, f, o, g], axis=-1)


def prepare_kernel_params(canonical_params):
    """Transpose, permute gate columns to (i, f, o, g), fuse the biases, and
    zero-pad the fc layer to a 128-lane-dense output width."""
    w_ih, w_hh, b_ih, b_hh, w_fc, b_fc = canonical_params
    H = w_hh.shape[1]
    D = w_fc.shape[0]

    wih_t = _reorder_gates_last_axis(w_ih.T)                         # (I, 4H)
    whh_t = _reorder_gates_last_axis(w_hh.T)                         # (H, 4H)
    b = _reorder_gates_last_axis(b_ih + b_hh).reshape(1, 4 * H)      # (1, 4H)

    Dp = ((D + 127) // 128) * 128                                    # lane-dense width
    wfc_t = w_fc.T                                                   # (H, D)
    bfc = b_fc.reshape(1, D)
    if Dp != D:
        wfc_t = jnp.pad(wfc_t, ((0, 0), (0, Dp - D)))
        bfc = jnp.pad(bfc, ((0, 0), (0, Dp - D)))
    return wih_t, whh_t, b, wfc_t, bfc


def _reference_forward(x, canonical_params):
    """Pure-JAX reference of nn.LSTM(batch_first=True) + per-step nn.Linear."""
    w_ih, w_hh, b_ih, b_hh, w_fc, b_fc = canonical_params
    B, T, I = x.shape
    H = w_hh.shape[1]
    wih_t, whh_t = w_ih.T, w_hh.T
    bias = (b_ih + b_hh)[None, :]

    def step(carry, x_t):
        h, c = carry
        gates = x_t @ wih_t + h @ whh_t + bias
        i_g = jax.nn.sigmoid(gates[:, 0 * H:1 * H])
        f_g = jax.nn.sigmoid(gates[:, 1 * H:2 * H])
        g_g = jnp.tanh(gates[:, 2 * H:3 * H])
        o_g = jax.nn.sigmoid(gates[:, 3 * H:4 * H])
        c_new = f_g * c + i_g * g_g
        h_new = o_g * jnp.tanh(c_new)
        return (h_new, c_new), h_new @ w_fc.T + b_fc

    init = (jnp.zeros((B, H), jnp.float32), jnp.zeros((B, H), jnp.float32))
    _, ys = lax.scan(step, init, jnp.transpose(x, (1, 0, 2)))
    return jnp.transpose(ys, (1, 0, 2))


if __name__ == "__main__":
    # Small shapes consistent with the module's forward.
    batch, seq_len = 2, 8
    input_size, hidden_units, dense_units = 16, 32, 16

    key = jax.random.PRNGKey(0)
    kx, kp = jax.random.split(key)
    x = jax.random.normal(kx, (batch, seq_len, input_size), jnp.float32)

    canonical = init_params(kp, input_size, hidden_units, dense_units)
    kparams = prepare_kernel_params(canonical)

    ref = jax.block_until_ready(_reference_forward(x, canonical))

    # f32 compute path: tight numerical check against the pure-JAX reference.
    out_f32 = jax.block_until_ready(
        lstm_model_forward(x, kparams, dense_units, compute_dtype=jnp.float32))
    assert out_f32.shape == (batch, seq_len, dense_units)
    assert jnp.allclose(out_f32, ref, atol=1e-4, rtol=1e-4), \
        float(jnp.max(jnp.abs(out_f32 - ref)))

    # Default bf16 MXU path (f32 accumulation / gate math): looser tolerance.
    out_bf16 = jax.block_until_ready(
        lstm_model_forward(x, kparams, dense_units))
    assert out_bf16.shape == (batch, seq_len, dense_units)
    assert jnp.allclose(out_bf16, ref, atol=7.5e-2, rtol=5e-2), \
        float(jnp.max(jnp.abs(out_bf16 - ref)))

    print("KERNEL_OK")
</pallas_src>

<mosaic_0001>
module attributes {stable_mosaic.version = 11 : i64} {
  func.func @_lstm_fc_kernel(%arg0: i32, %arg1: memref<64x16xf32, #tpu.memory_space<vmem>>, %arg2: memref<16x128xf32, #tpu.memory_space<vmem>>, %arg3: memref<32x128xf32, #tpu.memory_space<vmem>>, %arg4: memref<1x128xf32, #tpu.memory_space<vmem>>, %arg5: memref<32x128xf32, #tpu.memory_space<vmem>>, %arg6: memref<1x128xf32, #tpu.memory_space<vmem>>, %arg7: memref<64x128xf32, #tpu.memory_space<vmem>>, %arg8: memref<8x32xf32, #tpu.memory_space<vmem>>, %arg9: memref<8x32xf32, #tpu.memory_space<vmem>>, %arg10: memref<64x128xf32, #tpu.memory_space<vmem>>, %arg11: memref<64x32xf32, #tpu.memory_space<vmem>>) attributes {dimension_semantics = [#tpu.dimension_semantics<arbitrary>], iteration_bounds = array<i64: 1>, scalar_prefetch = 0 : i64, scratch_operands = 4 : i64, tpu.core_type = #tpu.core_type<tc>, window_params = [{transform_indices = @transform_0, window_bounds = array<i64: 64, 16>}, {pipeline_mode = #tpu.pipeline_mode<synchronous>, transform_indices = @transform_1, window_bounds = array<i64: 16, 128>}, {pipeline_mode = #tpu.pipeline_mode<synchronous>, transform_indices = @transform_2, window_bounds = array<i64: 32, 128>}, {pipeline_mode = #tpu.pipeline_mode<synchronous>, transform_indices = @transform_3, window_bounds = array<i64: 1, 128>}, {pipeline_mode = #tpu.pipeline_mode<synchronous>, transform_indices = @transform_4, window_bounds = array<i64: 32, 128>}, {pipeline_mode = #tpu.pipeline_mode<synchronous>, transform_indices = @transform_5, window_bounds = array<i64: 1, 128>}, {transform_indices = @transform_6, window_bounds = array<i64: 64, 128>}]} {
    %c0_i32 = arith.constant 0 : i32
    %0 = arith.cmpi eq, %arg0, %c0_i32 : i32
    %1 = arith.extui %0 : i1 to i32
    %c0_i32_0 = arith.constant 0 : i32
    %2 = arith.cmpi ne, %1, %c0_i32_0 : i32
    scf.if %2 {
      %cst_124 = arith.constant 0.000000e+00 : f32
      %242 = vector.broadcast %cst_124 : f32 to vector<8x32xf32>
      %c0_125 = arith.constant 0 : index
      %c0_126 = arith.constant 0 : index
      %243 = vector.load %arg8[%c0_125, %c0_126] : memref<8x32xf32, #tpu.memory_space<vmem>>, vector<8x32xf32>
      tpu.vector_store %arg8[%c0_125, %c0_126], %242 {strides = array<i32>} : memref<8x32xf32, #tpu.memory_space<vmem>>, vector<8x32xf32>,
      %cst_127 = arith.constant 0.000000e+00 : f32
      %244 = vector.broadcast %cst_127 : f32 to vector<8x32xf32>
      %c0_128 = arith.constant 0 : index
      %c0_129 = arith.constant 0 : index
      %245 = vector.load %arg9[%c0_128, %c0_129] : memref<8x32xf32, #tpu.memory_space<vmem>>, vector<8x32xf32>
      tpu.vector_store %arg9[%c0_128, %c0_129], %244 {strides = array<i32>} : memref<8x32xf32, #tpu.memory_space<vmem>>, vector<8x32xf32>,
    } else {
    }
    %c0 = arith.constant 0 : index
    %c0_1 = arith.constant 0 : index
    %3 = vector.load %arg1[%c0, %c0_1] : memref<64x16xf32, #tpu.memory_space<vmem>>, vector<64x16xf32>
    %c0_2 = arith.constant 0 : index
    %c0_3 = arith.constant 0 : index
    %4 = vector.load %arg2[%c0_2, %c0_3] : memref<16x128xf32, #tpu.memory_space<vmem>>, vector<16x128xf32>
    %cst = arith.constant dense<0.000000e+00> : vector<64x128xf32>
    %5 = tpu.matmul %3, %4, %cst {dimension_numbers = #tpu.dot_dimension_numbers<[1], [0], [0], [1], [0, 0, 1, 1], [], []>} : vector<64x16xf32>, vector<16x128xf32>, vector<64x128xf32> -> vector<64x128xf32>
    %c0_4 = arith.constant 0 : index
    %c0_5 = arith.constant 0 : index
    %6 = vector.load %arg4[%c0_4, %c0_5] : memref<1x128xf32, #tpu.memory_space<vmem>>, vector<1x128xf32>
    %7 = vector.broadcast %6 : vector<1x128xf32> to vector<64x128xf32>
    %8 = arith.addf %5, %7 : vector<64x128xf32>
    %c0_6 = arith.constant 0 : index
    %c0_7 = arith.constant 0 : index
    %9 = vector.load %arg10[%c0_6, %c0_7] : memref<64x128xf32, #tpu.memory_space<vmem>>, vector<64x128xf32>
    tpu.vector_store %arg10[%c0_6, %c0_7], %8 {strides = array<i32>} : memref<64x128xf32, #tpu.memory_space<vmem>>, vector<64x128xf32>,
    %c0_8 = arith.constant 0 : index
    %c0_9 = arith.constant 0 : index
    %10 = vector.load %arg3[%c0_8, %c0_9] : memref<32x128xf32, #tpu.memory_space<vmem>>, vector<32x128xf32>
    %c0_i32_10 = arith.constant 0 : i32
    %c8_i32 = arith.constant 8 : i32
    %11 = arith.muli %c0_i32_10, %c8_i32 : i32
    %12 = tpu.assume_multiple %11, 8 : i32
    %13 = arith.index_cast %12 : i32 to index
    %c0_11 = arith.constant 0 : index
    %14 = vector.load %arg10[%13, %c0_11] : memref<64x128xf32, #tpu.memory_space<vmem>>, vector<8x128xf32>
    %c0_12 = arith.constant 0 : index
    %c0_13 = arith.constant 0 : index
    %15 = vector.load %arg8[%c0_12, %c0_13] : memref<8x32xf32, #tpu.memory_space<vmem>>, vector<8x32xf32>
    %c0_14 = arith.constant 0 : index
    %c0_15 = arith.constant 0 : index
    %16 = vector.load %arg9[%c0_14, %c0_15] : memref<8x32xf32, #tpu.memory_space<vmem>>, vector<8x32xf32>
    %cst_16 = arith.constant dense<0.000000e+00> : vector<8x128xf32>
    %17 = tpu.matmul %15, %10, %cst_16 {dimension_numbers = #tpu.dot_dimension_numbers<[1], [0], [0], [1], [0, 0, 1, 1], [], []>} : vector<8x32xf32>, vector<32x128xf32>, vector<8x128xf32> -> vector<8x128xf32>
    %18 = arith.addf %14, %17 : vector<8x128xf32>
    %19 = vector.extract_strided_slice %18 {offsets = [0, 0], sizes = [8, 96], strides = [1, 1]} : vector<8x128xf32> to vector<8x96xf32>
    %20 = arith.negf %19 : vector<8x96xf32>
    %21 = math.exp %20 : vector<8x96xf32>
    %cst_17 = arith.constant 1.000000e+00 : f32
    %22 = vector.broadcast %cst_17 : f32 to vector<8x96xf32>
    %23 = arith.addf %22, %21 : vector<8x96xf32>
    %24 = arith.divf %22, %23 : vector<8x96xf32>
    %25 = vector.extract_strided_slice %18 {offsets = [0, 96], sizes = [8, 32], strides = [1, 1]} : vector<8x128xf32> to vector<8x32xf32>
    %26 = math.tanh %25 : vector<8x32xf32>
    %27 = vector.extract_strided_slice %24 {offsets = [0, 0], sizes = [8, 32], strides = [1, 1]} : vector<8x96xf32> to vector<8x32xf32>
    %28 = vector.extract_strided_slice %24 {offsets = [0, 32], sizes = [8, 32], strides = [1, 1]} : vector<8x96xf32> to vector<8x32xf32>
    %29 = vector.extract_strided_slice %24 {offsets = [0, 64], sizes = [8, 32], strides = [1, 1]} : vector<8x96xf32> to vector<8x32xf32>
    %30 = arith.mulf %28, %16 : vector<8x32xf32>
    %31 = arith.mulf %27, %26 : vector<8x32xf32>
    %32 = arith.addf %30, %31 : vector<8x32xf32>
    %33 = math.tanh %32 : vector<8x32xf32>
    %34 = arith.mulf %29, %33 : vector<8x32xf32>
    %c0_18 = arith.constant 0 : index
    %c0_19 = arith.constant 0 : index
    %35 = vector.load %arg9[%c0_18, %c0_19] : memref<8x32xf32, #tpu.memory_space<vmem>>, vector<8x32xf32>
    tpu.vector_store %arg9[%c0_18, %c0_19], %32 {strides = array<i32>} : memref<8x32xf32, #tpu.memory_space<vmem>>, vector<8x32xf32>,
    %c0_20 = arith.constant 0 : index
    %c0_21 = arith.constant 0 : index
    %36 = vector.load %arg8[%c0_20, %c0_21] : memref<8x32xf32, #tpu.memory_space<vmem>>, vector<8x32xf32>
    tpu.vector_store %arg8[%c0_20, %c0_21], %34 {strides = array<i32>} : memref<8x32xf32, #tpu.memory_space<vmem>>, vector<8x32xf32>,
    %37 = arith.index_cast %12 : i32 to index
    %c0_22 = arith.constant 0 : index
    %38 = vector.load %arg11[%37, %c0_22] : memref<64x32xf32, #tpu.memory_space<vmem>>, vector<8x32xf32>
    tpu.vector_store %arg11[%37, %c0_22], %34 {strides = array<i32>} : memref<64x32xf32, #tpu.memory_space<vmem>>, vector<8x32xf32>,
    %c1_i32 = arith.constant 1 : i32
    %c8_i32_23 = arith.constant 8 : i32
    %39 = arith.muli %c1_i32, %c8_i32_23 : i32
    %40 = tpu.assume_multiple %39, 8 : i32
    %41 = arith.index_cast %40 : i32 to index
    %c0_24 = arith.constant 0 : index
    %42 = vector.load %arg10[%41, %c0_24] : memref<64x128xf32, #tpu.memory_space<vmem>>, vector<8x128xf32>
    %c0_25 = arith.constant 0 : index
    %c0_26 = arith.constant 0 : index
    %43 = vector.load %arg8[%c0_25, %c0_26] : memref<8x32xf32, #tpu.memory_space<vmem>>, vector<8x32xf32>
    %c0_27 = arith.constant 0 : index
    %c0_28 = arith.constant 0 : index
    %44 = vector.load %arg9[%c0_27, %c0_28] : memref<8x32xf32, #tpu.memory_space<vmem>>, vector<8x32xf32>
    %cst_29 = arith.constant dense<0.000000e+00> : vector<8x128xf32>
    %45 = tpu.matmul %43, %10, %cst_29 {dimension_numbers = #tpu.dot_dimension_numbers<[1], [0], [0], [1], [0, 0, 1, 1], [], []>} : vector<8x32xf32>, vector<32x128xf32>, vector<8x128xf32> -> vector<8x128xf32>
    %46 = arith.addf %42, %45 : vector<8x128xf32>
    %47 = vector.extract_strided_slice %46 {offsets = [0, 0], sizes = [8, 96], strides = [1, 1]} : vector<8x128xf32> to vector<8x96xf32>
    %48 = arith.negf %47 : vector<8x96xf32>
    %49 = math.exp %48 : vector<8x96xf32>
    %cst_30 = arith.constant 1.000000e+00 : f32
    %50 = vector.broadcast %cst_30 : f32 to vector<8x96xf32>
    %51 = arith.addf %50, %49 : vector<8x96xf32>
    %52 = arith.divf %50, %51 : vector<8x96xf32>
    %53 = vector.extract_strided_slice %46 {offsets = [0, 96], sizes = [8, 32], strides = [1, 1]} : vector<8x128xf32> to vector<8x32xf32>
    %54 = math.tanh %53 : vector<8x32xf32>
    %55 = vector.extract_strided_slice %52 {offsets = [0, 0], sizes = [8, 32], strides = [1, 1]} : vector<8x96xf32> to vector<8x32xf32>
    %56 = vector.extract_strided_slice %52 {offsets = [0, 32], sizes = [8, 32], strides = [1, 1]} : vector<8x96xf32> to vector<8x32xf32>
    %57 = vector.extract_strided_slice %52 {offsets = [0, 64], sizes = [8, 32], strides = [1, 1]} : vector<8x96xf32> to vector<8x32xf32>
    %58 = arith.mulf %56, %44 : vector<8x32xf32>
    %59 = arith.mulf %55, %54 : vector<8x32xf32>
    %60 = arith.addf %58, %59 : vector<8x32xf32>
    %61 = math.tanh %60 : vector<8x32xf32>
    %62 = arith.mulf %57, %61 : vector<8x32xf32>
    %c0_31 = arith.constant 0 : index
    %c0_32 = arith.constant 0 : index
    %63 = vector.load %arg9[%c0_31, %c0_32] : memref<8x32xf32, #tpu.memory_space<vmem>>, vector<8x32xf32>
    tpu.vector_store %arg9[%c0_31, %c0_32], %60 {strides = array<i32>} : memref<8x32xf32, #tpu.memory_space<vmem>>, vector<8x32xf32>,
    %c0_33 = arith.constant 0 : index
    %c0_34 = arith.constant 0 : index
    %64 = vector.load %arg8[%c0_33, %c0_34] : memref<8x32xf32, #tpu.memory_space<vmem>>, vector<8x32xf32>
    tpu.vector_store %arg8[%c0_33, %c0_34], %62 {strides = array<i32>} : memref<8x32xf32, #tpu.memory_space<vmem>>, vector<8x32xf32>,
    %65 = arith.index_cast %40 : i32 to index
    %c0_35 = arith.constant 0 : index
    %66 = vector.load %arg11[%65, %c0_35] : memref<64x32xf32, #tpu.memory_space<vmem>>, vector<8x32xf32>
    tpu.vector_store %arg11[%65, %c0_35], %62 {strides = array<i32>} : memref<64x32xf32, #tpu.memory_space<vmem>>, vector<8x32xf32>,
    %c2_i32 = arith.constant 2 : i32
    %c8_i32_36 = arith.constant 8 : i32
    %67 = arith.muli %c2_i32, %c8_i32_36 : i32
    %68 = tpu.assume_multiple %67, 8 : i32
    %69 = arith.index_cast %68 : i32 to index
    %c0_37 = arith.constant 0 : index
    %70 = vector.load %arg10[%69, %c0_37] : memref<64x128xf32, #tpu.memory_space<vmem>>, vector<8x128xf32>
    %c0_38 = arith.constant 0 : index
    %c0_39 = arith.constant 0 : index
    %71 = vector.load %arg8[%c0_38, %c0_39] : memref<8x32xf32, #tpu.memory_space<vmem>>, vector<8x32xf32>
    %c0_40 = arith.constant 0 : index
    %c0_41 = arith.constant 0 : index
    %72 = vector.load %arg9[%c0_40, %c0_41] : memref<8x32xf32, #tpu.memory_space<vmem>>, vector<8x32xf32>
    %cst_42 = arith.constant dense<0.000000e+00> : vector<8x128xf32>
    %73 = tpu.matmul %71, %10, %cst_42 {dimension_numbers = #tpu.dot_dimension_numbers<[1], [0], [0], [1], [0, 0, 1, 1], [], []>} : vector<8x32xf32>, vector<32x128xf32>, vector<8x128xf32> -> vector<8x128xf32>
    %74 = arith.addf %70, %73 : vector<8x128xf32>
    %75 = vector.extract_strided_slice %74 {offsets = [0, 0], sizes = [8, 96], strides = [1, 1]} : vector<8x128xf32> to vector<8x96xf32>
    %76 = arith.negf %75 : vector<8x96xf32>
    %77 = math.exp %76 : vector<8x96xf32>
    %cst_43 = arith.constant 1.000000e+00 : f32
    %78 = vector.broadcast %cst_43 : f32 to vector<8x96xf32>
    %79 = arith.addf %78, %77 : vector<8x96xf32>
    %80 = arith.divf %78, %79 : vector<8x96xf32>
    %81 = vector.extract_strided_slice %74 {offsets = [0, 96], sizes = [8, 32], strides = [1, 1]} : vector<8x128xf32> to vector<8x32xf32>
    %82 = math.tanh %81 : vector<8x32xf32>
    %83 = vector.extract_strided_slice %80 {offsets = [0, 0], sizes = [8, 32], strides = [1, 1]} : vector<8x96xf32> to vector<8x32xf32>
    %84 = vector.extract_strided_slice %80 {offsets = [0, 32], sizes = [8, 32], strides = [1, 1]} : vector<8x96xf32> to vector<8x32xf32>
    %85 = vector.extract_strided_slice %80 {offsets = [0, 64], sizes = [8, 32], strides = [1, 1]} : vector<8x96xf32> to vector<8x32xf32>
    %86 = arith.mulf %84, %72 : vector<8x32xf32>
    %87 = arith.mulf %83, %82 : vector<8x32xf32>
    %88 = arith.addf %86, %87 : vector<8x32xf32>
    %89 = math.tanh %88 : vector<8x32xf32>
    %90 = arith.mulf %85, %89 : vector<8x32xf32>
    %c0_44 = arith.constant 0 : index
    %c0_45 = arith.constant 0 : index
    %91 = vector.load %arg9[%c0_44, %c0_45] : memref<8x32xf32, #tpu.memory_space<vmem>>, vector<8x32xf32>
    tpu.vector_store %arg9[%c0_44, %c0_45], %88 {strides = array<i32>} : memref<8x32xf32, #tpu.memory_space<vmem>>, vector<8x32xf32>,
    %c0_46 = arith.constant 0 : index
    %c0_47 = arith.constant 0 : index
    %92 = vector.load %arg8[%c0_46, %c0_47] : memref<8x32xf32, #tpu.memory_space<vmem>>, vector<8x32xf32>
    tpu.vector_store %arg8[%c0_46, %c0_47], %90 {strides = array<i32>} : memref<8x32xf32, #tpu.memory_space<vmem>>, vector<8x32xf32>,
    %93 = arith.index_cast %68 : i32 to index
    %c0_48 = arith.constant 0 : index
    %94 = vector.load %arg11[%93, %c0_48] : memref<64x32xf32, #tpu.memory_space<vmem>>, vector<8x32xf32>
    tpu.vector_store %arg11[%93, %c0_48], %90 {strides = array<i32>} : memref<64x32xf32, #tpu.memory_space<vmem>>, vector<8x32xf32>,
    %c3_i32 = arith.constant 3 : i32
    %c8_i32_49 = arith.constant 8 : i32
    %95 = arith.muli %c3_i32, %c8_i32_49 : i32
    %96 = tpu.assume_multiple %95, 8 : i32
    %97 = arith.index_cast %96 : i32 to index
    %c0_50 = arith.constant 0 : index
    %98 = vector.load %arg10[%97, %c0_50] : memref<64x128xf32, #tpu.memory_space<vmem>>, vector<8x128xf32>
    %c0_51 = arith.constant 0 : index
    %c0_52 = arith.constant 0 : index
    %99 = vector.load %arg8[%c0_51, %c0_52] : memref<8x32xf32, #tpu.memory_space<vmem>>, vector<8x32xf32>
    %c0_53 = arith.constant 0 : index
    %c0_54 = arith.constant 0 : index
    %100 = vector.load %arg9[%c0_53, %c0_54] : memref<8x32xf32, #tpu.memory_space<vmem>>, vector<8x32xf32>
    %cst_55 = arith.constant dense<0.000000e+00> : vector<8x128xf32>
    %101 = tpu.matmul %99, %10, %cst_55 {dimension_numbers = #tpu.dot_dimension_numbers<[1], [0], [0], [1], [0, 0, 1, 1], [], []>} : vector<8x32xf32>, vector<32x128xf32>, vector<8x128xf32> -> vector<8x128xf32>
    %102 = arith.addf %98, %101 : vector<8x128xf32>
    %103 = vector.extract_strided_slice %102 {offsets = [0, 0], sizes = [8, 96], strides = [1, 1]} : vector<8x128xf32> to vector<8x96xf32>
    %104 = arith.negf %103 : vector<8x96xf32>
    %105 = math.exp %104 : vector<8x96xf32>
    %cst_56 = arith.constant 1.000000e+00 : f32
    %106 = vector.broadcast %cst_56 : f32 to vector<8x96xf32>
    %107 = arith.addf %106, %105 : vector<8x96xf32>
    %108 = arith.divf %106, %107 : vector<8x96xf32>
    %109 = vector.extract_strided_slice %102 {offsets = [0, 96], sizes = [8, 32], strides = [1, 1]} : vector<8x128xf32> to vector<8x32xf32>
    %110 = math.tanh %109 : vector<8x32xf32>
    %111 = vector.extract_strided_slice %108 {offsets = [0, 0], sizes = [8, 32], strides = [1, 1]} : vector<8x96xf32> to vector<8x32xf32>
    %112 = vector.extract_strided_slice %108 {offsets = [0, 32], sizes = [8, 32], strides = [1, 1]} : vector<8x96xf32> to vector<8x32xf32>
    %113 = vector.extract_strided_slice %108 {offsets = [0, 64], sizes = [8, 32], strides = [1, 1]} : vector<8x96xf32> to vector<8x32xf32>
    %114 = arith.mulf %112, %100 : vector<8x32xf32>
    %115 = arith.mulf %111, %110 : vector<8x32xf32>
    %116 = arith.addf %114, %115 : vector<8x32xf32>
    %117 = math.tanh %116 : vector<8x32xf32>
    %118 = arith.mulf %113, %117 : vector<8x32xf32>
    %c0_57 = arith.constant 0 : index
    %c0_58 = arith.constant 0 : index
    %119 = vector.load %arg9[%c0_57, %c0_58] : memref<8x32xf32, #tpu.memory_space<vmem>>, vector<8x32xf32>
    tpu.vector_store %arg9[%c0_57, %c0_58], %116 {strides = array<i32>} : memref<8x32xf32, #tpu.memory_space<vmem>>, vector<8x32xf32>,
    %c0_59 = arith.constant 0 : index
    %c0_60 = arith.constant 0 : index
    %120 = vector.load %arg8[%c0_59, %c0_60] : memref<8x32xf32, #tpu.memory_space<vmem>>, vector<8x32xf32>
    tpu.vector_store %arg8[%c0_59, %c0_60], %118 {strides = array<i32>} : memref<8x32xf32, #tpu.memory_space<vmem>>, vector<8x32xf32>,
    %121 = arith.index_cast %96 : i32 to index
    %c0_61 = arith.constant 0 : index
    %122 = vector.load %arg11[%121, %c0_61] : memref<64x32xf32, #tpu.memory_space<vmem>>, vector<8x32xf32>
    tpu.vector_store %arg11[%121, %c0_61], %118 {strides = array<i32>} : memref<64x32xf32, #tpu.memory_space<vmem>>, vector<8x32xf32>,
    %c4_i32 = arith.constant 4 : i32
    %c8_i32_62 = arith.constant 8 : i32
    %123 = arith.muli %c4_i32, %c8_i32_62 : i32
    %124 = tpu.assume_multiple %123, 8 : i32
    %125 = arith.index_cast %124 : i32 to index
    %c0_63 = arith.constant 0 : index
    %126 = vector.load %arg10[%125, %c0_63] : memref<64x128xf32, #tpu.memory_space<vmem>>, vector<8x128xf32>
    %c0_64 = arith.constant 0 : index
    %c0_65 = arith.constant 0 : index
    %127 = vector.load %arg8[%c0_64, %c0_65] : memref<8x32xf32, #tpu.memory_space<vmem>>, vector<8x32xf32>
    %c0_66 = arith.constant 0 : index
    %c0_67 = arith.constant 0 : index
    %128 = vector.load %arg9[%c0_66, %c0_67] : memref<8x32xf32, #tpu.memory_space<vmem>>, vector<8x32xf32>
    %cst_68 = arith.constant dense<0.000000e+00> : vector<8x128xf32>
    %129 = tpu.matmul %127, %10, %cst_68 {dimension_numbers = #tpu.dot_dimension_numbers<[1], [0], [0], [1], [0, 0, 1, 1], [], []>} : vector<8x32xf32>, vector<32x128xf32>, vector<8x128xf32> -> vector<8x128xf32>
    %130 = arith.addf %126, %129 : vector<8x128xf32>
    %131 = vector.extract_strided_slice %130 {offsets = [0, 0], sizes = [8, 96], strides = [1, 1]} : vector<8x128xf32> to vector<8x96xf32>
    %132 = arith.negf %131 : vector<8x96xf32>
    %133 = math.exp %132 : vector<8x96xf32>
    %cst_69 = arith.constant 1.000000e+00 : f32
    %134 = vector.broadcast %cst_69 : f32 to vector<8x96xf32>
    %135 = arith.addf %134, %133 : vector<8x96xf32>
    %136 = arith.divf %134, %135 : vector<8x96xf32>
    %137 = vector.extract_strided_slice %130 {offsets = [0, 96], sizes = [8, 32], strides = [1, 1]} : vector<8x128xf32> to vector<8x32xf32>
    %138 = math.tanh %137 : vector<8x32xf32>
    %139 = vector.extract_strided_slice %136 {offsets = [0, 0], sizes = [8, 32], strides = [1, 1]} : vector<8x96xf32> to vector<8x32xf32>
    %140 = vector.extract_strided_slice %136 {offsets = [0, 32], sizes = [8, 32], strides = [1, 1]} : vector<8x96xf32> to vector<8x32xf32>
    %141 = vector.extract_strided_slice %136 {offsets = [0, 64], sizes = [8, 32], strides = [1, 1]} : vector<8x96xf32> to vector<8x32xf32>
    %142 = arith.mulf %140, %128 : vector<8x32xf32>
    %143 = arith.mulf %139, %138 : vector<8x32xf32>
    %144 = arith.addf %142, %143 : vector<8x32xf32>
    %145 = math.tanh %144 : vector<8x32xf32>
    %146 = arith.mulf %141, %145 : vector<8x32xf32>
    %c0_70 = arith.constant 0 : index
    %c0_71 = arith.constant 0 : index
    %147 = vector.load %arg9[%c0_70, %c0_71] : memref<8x32xf32, #tpu.memory_space<vmem>>, vector<8x32xf32>
    tpu.vector_store %arg9[%c0_70, %c0_71], %144 {strides = array<i32>} : memref<8x32xf32, #tpu.memory_space<vmem>>, vector<8x32xf32>,
    %c0_72 = arith.constant 0 : index
    %c0_73 = arith.constant 0 : index
    %148 = vector.load %arg8[%c0_72, %c0_73] : memref<8x32xf32, #tpu.memory_space<vmem>>, vector<8x32xf32>
    tpu.vector_store %arg8[%c0_72, %c0_73], %146 {strides = array<i32>} : memref<8x32xf32, #tpu.memory_space<vmem>>, vector<8x32xf32>,
    %149 = arith.index_cast %124 : i32 to index
    %c0_74 = arith.constant 0 : index
    %150 = vector.load %arg11[%149, %c0_74] : memref<64x32xf32, #tpu.memory_space<vmem>>, vector<8x32xf32>
    tpu.vector_store %arg11[%149, %c0_74], %146 {strides = array<i32>} : memref<64x32xf32, #tpu.memory_space<vmem>>, vector<8x32xf32>,
    %c5_i32 = arith.constant 5 : i32
    %c8_i32_75 = arith.constant 8 : i32
    %151 = arith.muli %c5_i32, %c8_i32_75 : i32
    %152 = tpu.assume_multiple %151, 8 : i32
    %153 = arith.index_cast %152 : i32 to index
    %c0_76 = arith.constant 0 : index
    %154 = vector.load %arg10[%153, %c0_76] : memref<64x128xf32, #tpu.memory_space<vmem>>, vector<8x128xf32>
    %c0_77 = arith.constant 0 : index
    %c0_78 = arith.constant 0 : index
    %155 = vector.load %arg8[%c0_77, %c0_78] : memref<8x32xf32, #tpu.memory_space<vmem>>, vector<8x32xf32>
    %c0_79 = arith.constant 0 : index
    %c0_80 = arith.constant 0 : index
    %156 = vector.load %arg9[%c0_79, %c0_80] : memref<8x32xf32, #tpu.memory_space<vmem>>, vector<8x32xf32>
    %cst_81 = arith.constant dense<0.000000e+00> : vector<8x128xf32>
    %157 = tpu.matmul %155, %10, %cst_81 {dimension_numbers = #tpu.dot_dimension_numbers<[1], [0], [0], [1], [0, 0, 1, 1], [], []>} : vector<8x32xf32>, vector<32x128xf32>, vector<8x128xf32> -> vector<8x128xf32>
    %158 = arith.addf %154, %157 : vector<8x128xf32>
    %159 = vector.extract_strided_slice %158 {offsets = [0, 0], sizes = [8, 96], strides = [1, 1]} : vector<8x128xf32> to vector<8x96xf32>
    %160 = arith.negf %159 : vector<8x96xf32>
    %161 = math.exp %160 : vector<8x96xf32>
    %cst_82 = arith.constant 1.000000e+00 : f32
    %162 = vector.broadcast %cst_82 : f32 to vector<8x96xf32>
    %163 = arith.addf %162, %161 : vector<8x96xf32>
    %164 = arith.divf %162, %163 : vector<8x96xf32>
    %165 = vector.extract_strided_slice %158 {offsets = [0, 96], sizes = [8, 32], strides = [1, 1]} : vector<8x128xf32> to vector<8x32xf32>
    %166 = math.tanh %165 : vector<8x32xf32>
    %167 = vector.extract_strided_slice %164 {offsets = [0, 0], sizes = [8, 32], strides = [1, 1]} : vector<8x96xf32> to vector<8x32xf32>
    %168 = vector.extract_strided_slice %164 {offsets = [0, 32], sizes = [8, 32], strides = [1, 1]} : vector<8x96xf32> to vector<8x32xf32>
    %169 = vector.extract_strided_slice %164 {offsets = [0, 64], sizes = [8, 32], strides = [1, 1]} : vector<8x96xf32> to vector<8x32xf32>
    %170 = arith.mulf %168, %156 : vector<8x32xf32>
    %171 = arith.mulf %167, %166 : vector<8x32xf32>
    %172 = arith.addf %170, %171 : vector<8x32xf32>
    %173 = math.tanh %172 : vector<8x32xf32>
    %174 = arith.mulf %169, %173 : vector<8x32xf32>
    %c0_83 = arith.constant 0 : index
    %c0_84 = arith.constant 0 : index
    %175 = vector.load %arg9[%c0_83, %c0_84] : memref<8x32xf32, #tpu.memory_space<vmem>>, vector<8x32xf32>
    tpu.vector_store %arg9[%c0_83, %c0_84], %172 {strides = array<i32>} : memref<8x32xf32, #tpu.memory_space<vmem>>, vector<8x32xf32>,
    %c0_85 = arith.constant 0 : index
    %c0_86 = arith.constant 0 : index
    %176 = vector.load %arg8[%c0_85, %c0_86] : memref<8x32xf32, #tpu.memory_space<vmem>>, vector<8x32xf32>
    tpu.vector_store %arg8[%c0_85, %c0_86], %174 {strides = array<i32>} : memref<8x32xf32, #tpu.memory_space<vmem>>, vector<8x32xf32>,
    %177 = arith.index_cast %152 : i32 to index
    %c0_87 = arith.constant 0 : index
    %178 = vector.load %arg11[%177, %c0_87] : memref<64x32xf32, #tpu.memory_space<vmem>>, vector<8x32xf32>
    tpu.vector_store %arg11[%177, %c0_87], %174 {strides = array<i32>} : memref<64x32xf32, #tpu.memory_space<vmem>>, vector<8x32xf32>,
    %c6_i32 = arith.constant 6 : i32
    %c8_i32_88 = arith.constant 8 : i32
    %179 = arith.muli %c6_i32, %c8_i32_88 : i32
    %180 = tpu.assume_multiple %179, 8 : i32
    %181 = arith.index_cast %180 : i32 to index
    %c0_89 = arith.constant 0 : index
    %182 = vector.load %arg10[%181, %c0_89] : memref<64x128xf32, #tpu.memory_space<vmem>>, vector<8x128xf32>
    %c0_90 = arith.constant 0 : index
    %c0_91 = arith.constant 0 : index
    %183 = vector.load %arg8[%c0_90, %c0_91] : memref<8x32xf32, #tpu.memory_space<vmem>>, vector<8x32xf32>
    %c0_92 = arith.constant 0 : index
    %c0_93 = arith.constant 0 : index
    %184 = vector.load %arg9[%c0_92, %c0_93] : memref<8x32xf32, #tpu.memory_space<vmem>>, vector<8x32xf32>
    %cst_94 = arith.constant dense<0.000000e+00> : vector<8x128xf32>
    %185 = tpu.matmul %183, %10, %cst_94 {dimension_numbers = #tpu.dot_dimension_numbers<[1], [0], [0], [1], [0, 0, 1, 1], [], []>} : vector<8x32xf32>, vector<32x128xf32>, vector<8x128xf32> -> vector<8x128xf32>
    %186 = arith.addf %182, %185 : vector<8x128xf32>
    %187 = vector.extract_strided_slice %186 {offsets = [0, 0], sizes = [8, 96], strides = [1, 1]} : vector<8x128xf32> to vector<8x96xf32>
    %188 = arith.negf %187 : vector<8x96xf32>
    %189 = math.exp %188 : vector<8x96xf32>
    %cst_95 = arith.constant 1.000000e+00 : f32
    %190 = vector.broadcast %cst_95 : f32 to vector<8x96xf32>
    %191 = arith.addf %190, %189 : vector<8x96xf32>
    %192 = arith.divf %190, %191 : vector<8x96xf32>
    %193 = vector.extract_strided_slice %186 {offsets = [0, 96], sizes = [8, 32], strides = [1, 1]} : vector<8x128xf32> to vector<8x32xf32>
    %194 = math.tanh %193 : vector<8x32xf32>
    %195 = vector.extract_strided_slice %192 {offsets = [0, 0], sizes = [8, 32], strides = [1, 1]} : vector<8x96xf32> to vector<8x32xf32>
    %196 = vector.extract_strided_slice %192 {offsets = [0, 32], sizes = [8, 32], strides = [1, 1]} : vector<8x96xf32> to vector<8x32xf32>
    %197 = vector.extract_strided_slice %192 {offsets = [0, 64], sizes = [8, 32], strides = [1, 1]} : vector<8x96xf32> to vector<8x32xf32>
    %198 = arith.mulf %196, %184 : vector<8x32xf32>
    %199 = arith.mulf %195, %194 : vector<8x32xf32>
    %200 = arith.addf %198, %199 : vector<8x32xf32>
    %201 = math.tanh %200 : vector<8x32xf32>
    %202 = arith.mulf %197, %201 : vector<8x32xf32>
    %c0_96 = arith.constant 0 : index
    %c0_97 = arith.constant 0 : index
    %203 = vector.load %arg9[%c0_96, %c0_97] : memref<8x32xf32, #tpu.memory_space<vmem>>, vector<8x32xf32>
    tpu.vector_store %arg9[%c0_96, %c0_97], %200 {strides = array<i32>} : memref<8x32xf32, #tpu.memory_space<vmem>>, vector<8x32xf32>,
    %c0_98 = arith.constant 0 : index
    %c0_99 = arith.constant 0 : index
    %204 = vector.load %arg8[%c0_98, %c0_99] : memref<8x32xf32, #tpu.memory_space<vmem>>, vector<8x32xf32>
    tpu.vector_store %arg8[%c0_98, %c0_99], %202 {strides = array<i32>} : memref<8x32xf32, #tpu.memory_space<vmem>>, vector<8x32xf32>,
    %205 = arith.index_cast %180 : i32 to index
    %c0_100 = arith.constant 0 : index
    %206 = vector.load %arg11[%205, %c0_100] : memref<64x32xf32, #tpu.memory_space<vmem>>, vector<8x32xf32>
    tpu.vector_store %arg11[%205, %c0_100], %202 {strides = array<i32>} : memref<64x32xf32, #tpu.memory_space<vmem>>, vector<8x32xf32>,
    %c7_i32 = arith.constant 7 : i32
    %c8_i32_101 = arith.constant 8 : i32
    %207 = arith.muli %c7_i32, %c8_i32_101 : i32
    %208 = tpu.assume_multiple %207, 8 : i32
    %209 = arith.index_cast %208 : i32 to index
    %c0_102 = arith.constant 0 : index
    %210 = vector.load %arg10[%209, %c0_102] : memref<64x128xf32, #tpu.memory_space<vmem>>, vector<8x128xf32>
    %c0_103 = arith.constant 0 : index
    %c0_104 = arith.constant 0 : index
    %211 = vector.load %arg8[%c0_103, %c0_104] : memref<8x32xf32, #tpu.memory_space<vmem>>, vector<8x32xf32>
    %c0_105 = arith.constant 0 : index
    %c0_106 = arith.constant 0 : index
    %212 = vector.load %arg9[%c0_105, %c0_106] : memref<8x32xf32, #tpu.memory_space<vmem>>, vector<8x32xf32>
    %cst_107 = arith.constant dense<0.000000e+00> : vector<8x128xf32>
    %213 = tpu.matmul %211, %10, %cst_107 {dimension_numbers = #tpu.dot_dimension_numbers<[1], [0], [0], [1], [0, 0, 1, 1], [], []>} : vector<8x32xf32>, vector<32x128xf32>, vector<8x128xf32> -> vector<8x128xf32>
    %214 = arith.addf %210, %213 : vector<8x128xf32>
    %215 = vector.extract_strided_slice %214 {offsets = [0, 0], sizes = [8, 96], strides = [1, 1]} : vector<8x128xf32> to vector<8x96xf32>
    %216 = arith.negf %215 : vector<8x96xf32>
    %217 = math.exp %216 : vector<8x96xf32>
    %cst_108 = arith.constant 1.000000e+00 : f32
    %218 = vector.broadcast %cst_108 : f32 to vector<8x96xf32>
    %219 = arith.addf %218, %217 : vector<8x96xf32>
    %220 = arith.divf %218, %219 : vector<8x96xf32>
    %221 = vector.extract_strided_slice %214 {offsets = [0, 96], sizes = [8, 32], strides = [1, 1]} : vector<8x128xf32> to vector<8x32xf32>
    %222 = math.tanh %221 : vector<8x32xf32>
    %223 = vector.extract_strided_slice %220 {offsets = [0, 0], sizes = [8, 32], strides = [1, 1]} : vector<8x96xf32> to vector<8x32xf32>
    %224 = vector.extract_strided_slice %220 {offsets = [0, 32], sizes = [8, 32], strides = [1, 1]} : vector<8x96xf32> to vector<8x32xf32>
    %225 = vector.extract_strided_slice %220 {offsets = [0, 64], sizes = [8, 32], strides = [1, 1]} : vector<8x96xf32> to vector<8x32xf32>
    %226 = arith.mulf %224, %212 : vector<8x32xf32>
    %227 = arith.mulf %223, %222 : vector<8x32xf32>
    %228 = arith.addf %226, %227 : vector<8x32xf32>
    %229 = math.tanh %228 : vector<8x32xf32>
    %230 = arith.mulf %225, %229 : vector<8x32xf32>
    %c0_109 = arith.constant 0 : index
    %c0_110 = arith.constant 0 : index
    %231 = vector.load %arg9[%c0_109, %c0_110] : memref<8x32xf32, #tpu.memory_space<vmem>>, vector<8x32xf32>
    tpu.vector_store %arg9[%c0_109, %c0_110], %228 {strides = array<i32>} : memref<8x32xf32, #tpu.memory_space<vmem>>, vector<8x32xf32>,
    %c0_111 = arith.constant 0 : index
    %c0_112 = arith.constant 0 : index
    %232 = vector.load %arg8[%c0_111, %c0_112] : memref<8x32xf32, #tpu.memory_space<vmem>>, vector<8x32xf32>
    tpu.vector_store %arg8[%c0_111, %c0_112], %230 {strides = array<i32>} : memref<8x32xf32, #tpu.memory_space<vmem>>, vector<8x32xf32>,
    %233 = arith.index_cast %208 : i32 to index
    %c0_113 = arith.constant 0 : index
    %234 = vector.load %arg11[%233, %c0_113] : memref<64x32xf32, #tpu.memory_space<vmem>>, vector<8x32xf32>
    tpu.vector_store %arg11[%233, %c0_113], %230 {strides = array<i32>} : memref<64x32xf32, #tpu.memory_space<vmem>>, vector<8x32xf32>,
    %c8_i32_114 = arith.constant 8 : i32
    %c0_115 = arith.constant 0 : index
    %c0_116 = arith.constant 0 : index
    %235 = vector.load %arg11[%c0_115, %c0_116] : memref<64x32xf32, #tpu.memory_space<vmem>>, vector<64x32xf32>
    %c0_117 = arith.constant 0 : index
    %c0_118 = arith.constant 0 : index
    %236 = vector.load %arg5[%c0_117, %c0_118] : memref<32x128xf32, #tpu.memory_space<vmem>>, vector<32x128xf32>
    %cst_119 = arith.constant dense<0.000000e+00> : vector<64x128xf32>
    %237 = tpu.matmul %235, %236, %cst_119 {dimension_numbers = #tpu.dot_dimension_numbers<[1], [0], [0], [1], [0, 0, 1, 1], [], []>} : vector<64x32xf32>, vector<32x128xf32>, vector<64x128xf32> -> vector<64x128xf32>
    %c0_120 = arith.constant 0 : index
    %c0_121 = arith.constant 0 : index
    %238 = vector.load %arg6[%c0_120, %c0_121] : memref<1x128xf32, #tpu.memory_space<vmem>>, vector<1x128xf32>
    %239 = vector.broadcast %238 : vector<1x128xf32> to vector<64x128xf32>
    %240 = arith.addf %237, %239 : vector<64x128xf32>
    %c0_122 = arith.constant 0 : index
    %c0_123 = arith.constant 0 : index
    %241 = vector.load %arg7[%c0_122, %c0_123] : memref<64x128xf32, #tpu.memory_space<vmem>>, vector<64x128xf32>
    tpu.vector_store %arg7[%c0_122, %c0_123], %240 {strides = array<i32>} : memref<64x128xf32, #tpu.memory_space<vmem>>, vector<64x128xf32>,
    return
  }
  func.func @transform_0(%arg0: i32) -> (i32, i32) {
    %c0_i32 = arith.constant 0 : i32
    %c0_i32_0 = arith.constant 0 : i32
    return %arg0, %c0_i32 : i32, i32
  }
  func.func @transform_1(%arg0: i32) -> (i32, i32) {
    %c0_i32 = arith.constant 0 : i32
    %c0_i32_0 = arith.constant 0 : i32
    %c0_i32_1 = arith.constant 0 : i32
    return %c0_i32, %c0_i32_0 : i32, i32
  }
  func.func @transform_2(%arg0: i32) -> (i32, i32) {
    %c0_i32 = arith.constant 0 : i32
    %c0_i32_0 = arith.constant 0 : i32
    %c0_i32_1 = arith.constant 0 : i32
    return %c0_i32, %c0_i32_0 : i32, i32
  }
  func.func @transform_3(%arg0: i32) -> (i32, i32) {
    %c0_i32 = arith.constant 0 : i32
    %c0_i32_0 = arith.constant 0 : i32
    %c0_i32_1 = arith.constant 0 : i32
    return %c0_i32, %c0_i32_0 : i32, i32
  }
  func.func @transform_4(%arg0: i32) -> (i32, i32) {
    %c0_i32 = arith.constant 0 : i32
    %c0_i32_0 = arith.constant 0 : i32
    %c0_i32_1 = arith.constant 0 : i32
    return %c0_i32, %c0_i32_0 : i32, i32
  }
  func.func @transform_5(%arg0: i32) -> (i32, i32) {
    %c0_i32 = arith.constant 0 : i32
    %c0_i32_0 = arith.constant 0 : i32
    %c0_i32_1 = arith.constant 0 : i32
    return %c0_i32, %c0_i32_0 : i32, i32
  }
  func.func @transform_6(%arg0: i32) -> (i32, i32) {
    %c0_i32 = arith.constant 0 : i32
    %c0_i32_0 = arith.constant 0 : i32
    return %arg0, %c0_i32 : i32, i32
  }
}

</mosaic_0001>

<bundles_post_ra>
// kernel: tpu_custom_call.1
= control target key start
LH: loop header
LB: loop body
LE: loop exit
PB: predicated region body
PF: predicated region fallthrough
CT: control target
= control target key end

     0   :  { %vm48_vm0 = vcmask 130048   ;;  %vm28_vm1 = vcmask 261120   ;;  %v1684_v7 = vmov 0.0   ;;  %s1984_s0 = inlined_call_operand.vmem [shape: f32[64,16], index: 0, kind: input, shape index: {}]   ;;  %s1985_s1 = inlined_call_operand.vmem [shape: f32[16,128], index: 1, kind: input, shape index: {}]   ;;  %s1986_s2 = inlined_call_operand.vmem [shape: f32[32,128], index: 2, kind: input, shape index: {}]   ;;  %s1987_s3 = inlined_call_operand.vmem [shape: f32[1,128], index: 3, kind: input, shape index: {}]   ;;  %s1988_s4 = inlined_call_operand.vmem [shape: f32[32,128], index: 4, kind: input, shape index: {}]   ;;  %s1989_s5 = inlined_call_operand.vmem [shape: f32[1,128], index: 5, kind: input, shape index: {}]   ;;  %s1990_s6 = inlined_call_operand.hbm [shape: f32[64,128], index: 6, kind: output, shape index: {}]  }
   0x1   :  { %v39_v0 = vld [vmem:[%s1985_s1] sm:$0xff]  ;;  %v40_v1 = vld [vmem:[%s1985_s1 + $0x8] sm:$0xff]  ;;  %29 = vst.msk [vmem:[#allocation2] sm:$0xff] %vm28_vm1, %v1684_v7  ;;  %30 = vst.msk [vmem:[#allocation3] sm:$0xff] %vm28_vm1, %v1684_v7 }
   0x2   :  { %v35_v2 = vld [vmem:[%s1984_s0 + $0x20] sm:$0xff]  ;;  %v1525_v3 = vpack.c.bf16 %v40_v1, %v39_v0  ;;  %v187_v5 = vld [vmem:[%s1986_s2 + $0x8] sm:$0xff] }
   0x3   :  { %1411 = vmatprep.mubr.msk.f32.mxu1 %vm48_vm0, %v35_v2  ;;  %v186_v4 = vld [vmem:[%s1986_s2] sm:$0xff]  ;;  %v36_v8 = vld [vmem:[%s1984_s0 + $0x28] sm:$0xff] }
   0x4   :  { %v31_v6 = vld [vmem:[%s1984_s0] sm:$0xff]  ;;  %1585 = vmatprep.subr.bf16.mxu1 %v1525_v3  ;;  %1526 = vmatprep.subr.bf16.mxu0 %v1525_v3  ;;  %v1754_v9 = vpack.c.bf16 %v187_v5, %v186_v4  ;;  %v32_v10 = vld [vmem:[%s1984_s0 + $0x8] sm:$0xff] }
   0x5   :  { %1586 = vmatpush3.bf16.msra.mxu1 %v1525_v3  ;;  %1528 = vmatpush3.bf16.msra.mxu0 %v1525_v3 }
   0x6   :  { %11 = vsyncpa [#allocation7], 0  ;;  %v1685_v11 = vmov 0.0|0.0   ;;  %v37_v12 = vld [vmem:[%s1984_s0 + $0x30] sm:$0xff]  ;;  %1405 = vmatprep.mubr.msk.f32.mxu0 %vm48_vm0, %v31_v6  ;;  %v189_v14 = vld [vmem:[%s1986_s2 + $0x18] sm:$0xff]  ;;  %vm1686_vm2 = vmmov 0  }
   0x7   :  { %1529 = vmatprep.subr.bf16.mxu1 %v1685_v11  ;;  %v188_v13 = vld [vmem:[%s1986_s2 + $0x10] sm:$0xff]  ;;  %1541 = vmatprep.subr.bf16.mxu0 %v1685_v11  ;;  %v38_v15 = vld [vmem:[%s1984_s0 + $0x38] sm:$0xff]  ;;  %v1804_v22 = vld [vmem:[%s1987_s3] ss:$0 sm:$0xff]  ;;  %s1687_s21 = smov 32   ;;  %s1688_s3 = smov 96  }
   0x8   :  { %1412 = vmatmul.mubr.msk.f32.vlgmr.msra.gmra.mrb[0].mxu1 %vm48_vm0, %v36_v8  ;;  %1406 = vmatmul.mubr.msk.f32.vlgmr.msra.gmra.mrb[0].mxu0 %vm48_vm0, %v32_v10  ;;  %v1778_v16 = vpack.c.bf16 %v189_v14, %v188_v13  ;;  %v191_v17 = vld [vmem:[#allocation2] sm:$0xff]  ;;  %v192_v30 = vld [vmem:[#allocation3] sm:$0xff]  ;;  %s1689_s22 = smov 64   ;;  %v33_v0 = vld [vmem:[%s1984_s0 + $0x10] sm:$0xff] }
   0x9   :  { %1531 = vmatpush3.bf16.msra.mxu1 %v1754_v9  ;;  %1414 = vmatprep.mubr.msk.f32.mxu1 %vm48_vm0, %v37_v12  ;;  %v34_v1 = vld [vmem:[%s1984_s0 + $0x18] sm:$0xff] }
   0xa   :  { %1532 = vmatprep.subr.bf16.mxu1 %v1685_v11  ;;  %1543 = vmatpush3.bf16.msra.mxu0 %v1754_v9 }
   0xb   :  { %1544 = vmatprep.subr.bf16.mxu0 %v1685_v11  ;;  %1408 = vmatprep.mubr.msk.f32.mxu0 %vm48_vm0, %v33_v0 }
   0xc   :  { %1415 = vmatmul.mubr.msk.f32.gmra.mrb[2].mxu1 %vm48_vm0, %v38_v15  ;;  %1409 = vmatmul.mubr.msk.f32.gmra.mrb[2].mxu0 %vm48_vm0, %v34_v1 }
   0xd   :  { %1534 = vmatpush3.bf16.msra.mxu1 %v1778_v16  ;;  %1425 = vmatprep.mubr.msk.f32.mxu1 %vm1686_vm2, %v1684_v7 }
   0xe   :  { %1535 = vmatprep.subr.bf16.mxu1 %v1685_v11  ;;  %1546 = vmatpush3.bf16.msra.mxu0 %v1778_v16 }
   0xf   :  { %1553 = vmatprep.subr.bf16.mxu0 %v1685_v11  ;;  %1447 = vmatprep.mubr.msk.f32.mxu0 %vm1686_vm2, %v1684_v7 }
  0x10   :  { %1426 = vmatmul.mubr.msk.f32.vlgmr.msra.gmra.mrb[4].mxu1 %vm28_vm1, %v191_v17 }
  0x11   :  { %1537 = vmatpush3.bf16.msra.mxu1 %v1754_v9  ;;  %1436 = vmatprep.mubr.msk.f32.mxu1 %vm1686_vm2, %v1684_v7 }
  0x12   :  { %1538 = vmatprep.subr.bf16.mxu1 %v1685_v11 }
  0x15   :  { %1540 = vmatpush3.bf16.msra.mxu1 %v1778_v16 }
  0x16   :  { %1547 = vmatprep.subr.bf16.mxu1 %v1685_v11 }
  0xdb   :  { %v1797_v18 = vpop.f32.mrb[0].mxu1  ;;  %v1407_v19 = vpop.f32.mrb[0].mxu0 }
  0xdc   :  { %v1799_v20 = vpop.f32.mrb[1].mxu1  ;;  %v139_v21 = vpop.f32.mrb[1].mxu0  ;;  %v145_v48 = vadd.f32 %v1407_v19, %v1804_v22 }
  0xdd   :  { %v140_v25 = vadd.f32 %v1804_v22, %v139_v21 }
  0xdf   :  { %v1806_v23 = vpop.f32.mrb[2].mxu1  ;;  %v1410_v10 = vpop.f32.mrb[2].mxu0 }
  0xe0   :  { %v1808_v24 = vpop.f32.mrb[3].mxu1  ;;  %v149_v12 = vpop.f32.mrb[3].mxu0 }
  0xe1   :  { %v150_v13 = vadd.f32 %v1804_v22, %v149_v12 }
  0xe3   :  { %v263_v26 = vpop.f32.mrb[4].mxu1 }
  0xe4   :  { %v267_v27 = vadd.f32 %v263_v26, %v140_v25  ;;  %v1427_v28 = vpop.f32.mrb[5].mxu1 }
  0xe6   :  { %1596 = vtanh.f32 %v267_v27  ;;  %v1315_v31 = vmul.f32 -1.442695, %v267_v27 }
  0xe8   :  { %1598 = vpow2.f32 %v1315_v31 }
  0xf0   :  { %v1597_v29 = vpop.eup %1596 }
  0xf1   :  { %281 = vrot.lane.b32.xlu0 %v1597_v29, %s1687_s21 }
  0xf2   :  { %v1599_v32 = vpop.eup %1598 }
  0xf3   :  { %v271_v33 = vadd.f32 1.0, %v1599_v32 }
  0xf5   :  { %276 = vrot.lane.b32.xlu0 %v192_v30, %s1687_s21  ;;  %1600 = vrcp.f32 %v271_v33 }
  0xff   :  { %v1601_v34 = vpop.eup %1600 }
 0x163   :  { %v282_v35 = vpop.permute.xlu0 %281 }
 0x164   :  { %v284_v36 = vmul.f32 %v1601_v34, %v282_v35 }
 0x166   :  { %286 = vrot.lane.b32.xlu1 %v284_v36, %s1687_s21 }
 0x167   :  { %v277_v37 = vpop.permute.xlu0 %276 }
 0x168   :  { %v279_v38 = vmul.f32 %v1601_v34, %v277_v37 }
 0x1d8   :  { %v287_v39 = vpop.permute.xlu1 %286 }
 0x1d9   :  { %v289_v40 = vadd.f32 %v287_v39, %v279_v38 }
 0x1db   :  { %1602 = vtanh.f32 %v289_v40 }
 0x1e5   :  { %v1603_v41 = vpop.eup %1602 }
 0x1e6   :  { %292 = vrot.lane.b32.xlu1 %v1603_v41, %s1687_s21  ;;  %v155_v41 = vadd.f32 %v1410_v10, %v1804_v22 }
 0x1ea   :  { %297 = vrot.lane.b32.xlu1 %v289_v40, %s1688_s3 }
 0x258   :  { %v293_v42 = vpop.permute.xlu1 %292 }
 0x259   :  { %v295_v43 = vmul.f32 %v1601_v34, %v293_v42 }
 0x25b   :  { %302 = vrot.lane.b32.xlu0 %v295_v43, %s1689_s22 }
 0x25c   :  { %v298_v44 = vpop.permute.xlu1 %297 }
 0x25d   :  { %300 = vst.msk [vmem:[#allocation3] sm:$0xff] %vm28_vm1, %v298_v44 }
 0x264   :  { %v310_v45 = vld [vmem:[#allocation3] sm:$0xff] }
 0x265   :  { %393 = vrot.lane.b32.xlu1 %v310_v45, %s1687_s21 }
 0x2cd   :  { %v303_v46 = vpop.permute.xlu0 %302 }
 0x2ce   :  { %305 = vst.msk [vmem:[#allocation2] sm:$0xff] %vm28_vm1, %v303_v46  ;;  %306 = vst.msk [vmem:[#allocation5] sm:$0xff] %vm28_vm1, %v303_v46 }
 0x2d5   :  { %v309_v47 = vld [vmem:[#allocation2] sm:$0xff] }
 0x2d6   :  { %1437 = vmatmul.mubr.msk.f32.vlgmr.msra.gmra.mrb[6].mxu1 %vm28_vm1, %v309_v47 }
 0x2d7   :  { %1549 = vmatpush3.bf16.msra.mxu1 %v1754_v9  ;;  %1458 = vmatprep.mubr.msk.f32.mxu1 %vm1686_vm2, %v1684_v7  ;;  %v394_v59 = vpop.permute.xlu1 %393 }
 0x2d8   :  { %1550 = vmatprep.subr.bf16.mxu1 %v1685_v11 }
 0x2db   :  { %1552 = vmatpush3.bf16.msra.mxu1 %v1778_v16 }
 0x2dc   :  { %1559 = vmatprep.subr.bf16.mxu1 %v1685_v11 }
 0x3a9   :  { %v380_v49 = vpop.f32.mrb[6].mxu1 }
 0x3aa   :  { %v384_v50 = vadd.f32 %v380_v49, %v145_v48  ;;  %v1438_v51 = vpop.f32.mrb[7].mxu1 }
 0x3ac   :  { %1604 = vtanh.f32 %v384_v50  ;;  %v1317_v53 = vmul.f32 -1.442695, %v384_v50 }
 0x3ae   :  { %1606 = vpow2.f32 %v1317_v53 }
 0x3b6   :  { %v1605_v52 = vpop.eup %1604 }
 0x3b7   :  { %398 = vrot.lane.b32.xlu0 %v1605_v52, %s1687_s21 }
 0x3b8   :  { %v1607_v54 = vpop.eup %1606 }
 0x3b9   :  { %v388_v55 = vadd.f32 1.0, %v1607_v54 }
 0x3bb   :  { %1608 = vrcp.f32 %v388_v55 }
 0x3c5   :  { %v1609_v56 = vpop.eup %1608 }
 0x3c6   :  { %v396_v60 = vmul.f32 %v1609_v56, %v394_v59 }
 0x429   :  { %v399_v57 = vpop.permute.xlu0 %398 }
 0x42a   :  { %v401_v58 = vmul.f32 %v1609_v56, %v399_v57 }
 0x42c   :  { %403 = vrot.lane.b32.xlu0 %v401_v58, %s1687_s21 }
 0x49e   :  { %v404_v61 = vpop.permute.xlu0 %403 }
 0x49f   :  { %v406_v62 = vadd.f32 %v404_v61, %v396_v60 }
 0x4a1   :  { %1610 = vtanh.f32 %v406_v62 }
 0x4ab   :  { %v1611_v63 = vpop.eup %1610 }
 0x4ac   :  { %409 = vrot.lane.b32.xlu1 %v1611_v63, %s1687_s21  ;;  %v160_v63 = vadd.f32 %v1804_v22, %v1799_v20 }
 0x4b0   :  { %414 = vrot.lane.b32.xlu1 %v406_v62, %s1688_s3 }
 0x51e   :  { %v410_v2 = vpop.permute.xlu1 %409 }
 0x51f   :  { %v412_v3 = vmul.f32 %v1609_v56, %v410_v2 }
 0x521   :  { %419 = vrot.lane.b32.xlu0 %v412_v3, %s1689_s22 }
 0x522   :  { %v415_v4 = vpop.permute.xlu1 %414 }
 0x523   :  { %417 = vst.msk [vmem:[#allocation3] sm:$0xff] %vm28_vm1, %v415_v4 }
 0x52a   :  { %v428_v5 = vld [vmem:[#allocation3] sm:$0xff] }
 0x52b   :  { %511 = vrot.lane.b32.xlu1 %v428_v5, %s1687_s21 }
 0x593   :  { %v420_v6 = vpop.permute.xlu0 %419 }
 0x594   :  { %422 = vst.msk [vmem:[#allocation2] sm:$0xff] %vm28_vm1, %v420_v6  ;;  %424 = vst.msk [vmem:[#allocation5 + $0x8] sm:$0xff] %vm28_vm1, %v420_v6 }
 0x59b   :  { %v427_v8 = vld [vmem:[#allocation2] sm:$0xff] }
 0x59c   :  { %1448 = vmatmul.mubr.msk.f32.vlgmr.msra.gmra.mrb[4].mxu0 %vm28_vm1, %v427_v8 }
 0x59d   :  { %1555 = vmatpush3.bf16.msra.mxu0 %v1754_v9  ;;  %1469 = vmatprep.mubr.msk.f32.mxu0 %vm1686_vm2, %v1684_v7  ;;  %v512_v30 = vpop.permute.xlu1 %511 }
 0x59e   :  { %1556 = vmatprep.subr.bf16.mxu0 %v1685_v11 }
 0x5a1   :  { %1558 = vmatpush3.bf16.msra.mxu0 %v1778_v16 }
 0x5a2   :  { %1565 = vmatprep.subr.bf16.mxu0 %v1685_v11 }
 0x66f   :  { %v498_v14 = vpop.f32.mrb[4].mxu0 }
 0x670   :  { %v502_v15 = vadd.f32 %v498_v14, %v150_v13  ;;  %v1449_v17 = vpop.f32.mrb[5].mxu0 }
 0x672   :  { %1612 = vtanh.f32 %v502_v15  ;;  %v1319_v21 = vmul.f32 -1.442695, %v502_v15 }
 0x674   :  { %1614 = vpow2.f32 %v1319_v21 }
 0x67c   :  { %v1613_v19 = vpop.eup %1612 }
 0x67d   :  { %516 = vrot.lane.b32.xlu0 %v1613_v19, %s1687_s21 }
 0x67e   :  { %v1615_v25 = vpop.eup %1614 }
 0x67f   :  { %v506_v26 = vadd.f32 1.0, %v1615_v25 }
 0x681   :  { %1616 = vrcp.f32 %v506_v26 }
 0x68b   :  { %v1617_v27 = vpop.eup %1616 }
 0x68c   :  { %v514_v31 = vmul.f32 %v1617_v27, %v512_v30 }
 0x6ef   :  { %v517_v28 = vpop.permute.xlu0 %516 }
 0x6f0   :  { %v519_v29 = vmul.f32 %v1617_v27, %v517_v28 }
 0x6f2   :  { %521 = vrot.lane.b32.xlu0 %v519_v29, %s1687_s21  ;;  %v165_v29 = vadd.f32 %v1797_v18, %v1804_v22 }
 0x764   :  { %v522_v32 = vpop.permute.xlu0 %521 }
 0x765   :  { %v524_v33 = vadd.f32 %v522_v32, %v514_v31 }
 0x767   :  { %1618 = vtanh.f32 %v524_v33 }
 0x771   :  { %v1619_v34 = vpop.eup %1618 }
 0x772   :  { %527 = vrot.lane.b32.xlu1 %v1619_v34, %s1687_s21 }
 0x776   :  { %532 = vrot.lane.b32.xlu1 %v524_v33, %s1688_s3 }
 0x7e4   :  { %v528_v35 = vpop.permute.xlu1 %527 }
 0x7e5   :  { %v530_v36 = vmul.f32 %v1617_v27, %v528_v35 }
 0x7e7   :  { %537 = vrot.lane.b32.xlu0 %v530_v36, %s1689_s22 }
 0x7e8   :  { %v533_v37 = vpop.permute.xlu1 %532 }
 0x7e9   :  { %535 = vst.msk [vmem:[#allocation3] sm:$0xff] %vm28_vm1, %v533_v37 }
 0x7f0   :  { %v546_v38 = vld [vmem:[#allocation3] sm:$0xff] }
 0x7f1   :  { %629 = vrot.lane.b32.xlu1 %v546_v38, %s1687_s21 }
 0x859   :  { %v538_v39 = vpop.permute.xlu0 %537 }
 0x85a   :  { %540 = vst.msk [vmem:[#allocation2] sm:$0xff] %vm28_vm1, %v538_v39  ;;  %542 = vst.msk [vmem:[#allocation5 + $0x10] sm:$0xff] %vm28_vm1, %v538_v39 }
 0x861   :  { %v545_v40 = vld [vmem:[#allocation2] sm:$0xff] }
 0x862   :  { %1459 = vmatmul.mubr.msk.f32.vlgmr.msra.gmra.mrb[8].mxu1 %vm28_vm1, %v545_v40  ;;  %v1141_v40 = vld [vmem:[%s1988_s4] sm:$0xff] }
 0x863   :  { %1561 = vmatpush3.bf16.msra.mxu1 %v1754_v9  ;;  %1480 = vmatprep.mubr.msk.f32.mxu1 %vm1686_vm2, %v1684_v7  ;;  %v630_v52 = vpop.permute.xlu1 %629 }
 0x864   :  { %1562 = vmatprep.subr.bf16.mxu1 %v1685_v11 }
 0x867   :  { %1564 = vmatpush3.bf16.msra.mxu1 %v1778_v16 }
 0x868   :  { %1571 = vmatprep.subr.bf16.mxu1 %v1685_v11 }
 0x935   :  { %v616_v42 = vpop.f32.mrb[8].mxu1 }
 0x936   :  { %v620_v43 = vadd.f32 %v616_v42, %v155_v41  ;;  %v1460_v44 = vpop.f32.mrb[9].mxu1  ;;  %v1142_v41 = vld [vmem:[%s1988_s4 + $0x8] sm:$0xff] }
 0x937   :  { %v1577_v42 = vpack.c.bf16 %v1142_v41, %v1141_v40 }
 0x938   :  { %1620 = vtanh.f32 %v620_v43  ;;  %v1321_v46 = vmul.f32 -1.442695, %v620_v43 }
 0x93a   :  { %1622 = vpow2.f32 %v1321_v46 }
 0x942   :  { %v1621_v45 = vpop.eup %1620 }
 0x943   :  { %634 = vrot.lane.b32.xlu0 %v1621_v45, %s1687_s21 }
 0x944   :  { %v1623_v47 = vpop.eup %1622 }
 0x945   :  { %v624_v48 = vadd.f32 1.0, %v1623_v47 }
 0x947   :  { %1624 = vrcp.f32 %v624_v48  ;;  %v1143_v48 = vld [vmem:[%s1988_s4 + $0x10] sm:$0xff] }
 0x951   :  { %v1625_v49 = vpop.eup %1624 }
 0x952   :  { %v632_v53 = vmul.f32 %v1625_v49, %v630_v52  ;;  %v1133_v52 = vld [vmem:[#allocation5] sm:$0xff] }
 0x9b5   :  { %v635_v50 = vpop.permute.xlu0 %634 }
 0x9b6   :  { %v637_v51 = vmul.f32 %v1625_v49, %v635_v50 }
 0x9b8   :  { %639 = vrot.lane.b32.xlu0 %v637_v51, %s1687_s21 }
 0xa2a   :  { %v640_v54 = vpop.permute.xlu0 %639 }
 0xa2b   :  { %v642_v55 = vadd.f32 %v640_v54, %v632_v53  ;;  %v1134_v53 = vld [vmem:[#allocation5 + $0x8] sm:$0xff]  ;;  %v1135_v54 = vld [vmem:[#allocation5 + $0x10] sm:$0xff] }
 0xa2d   :  { %1626 = vtanh.f32 %v642_v55 }
 0xa37   :  { %v1627_v56 = vpop.eup %1626 }
 0xa38   :  { %645 = vrot.lane.b32.xlu1 %v1627_v56, %s1687_s21 }
 0xa3c   :  { %650 = vrot.lane.b32.xlu1 %v642_v55, %s1688_s3 }
 0xaaa   :  { %v646_v57 = vpop.permute.xlu1 %645 }
 0xaab   :  { %v648_v58 = vmul.f32 %v1625_v49, %v646_v57  ;;  %v1144_v49 = vld [vmem:[%s1988_s4 + $0x18] sm:$0xff] }
 0xaac   :  { %v1581_v50 = vpack.c.bf16 %v1144_v49, %v1143_v48 }
 0xaad   :  { %655 = vrot.lane.b32.xlu0 %v648_v58, %s1689_s22  ;;  %v170_v58 = vadd.f32 %v1804_v22, %v1808_v24 }
 0xaae   :  { %v651_v59 = vpop.permute.xlu1 %650 }
 0xaaf   :  { %653 = vst.msk [vmem:[#allocation3] sm:$0xff] %vm28_vm1, %v651_v59 }
 0xab6   :  { %v664_v60 = vld [vmem:[#allocation3] sm:$0xff] }
 0xab7   :  { %747 = vrot.lane.b32.xlu1 %v664_v60, %s1687_s21 }
 0xb1f   :  { %v656_v61 = vpop.permute.xlu0 %655 }
 0xb20   :  { %658 = vst.msk [vmem:[#allocation2] sm:$0xff] %vm28_vm1, %v656_v61  ;;  %660 = vst.msk [vmem:[#allocation5 + $0x18] sm:$0xff] %vm28_vm1, %v656_v61 }
 0xb27   :  { %v663_v62 = vld [vmem:[#allocation2] sm:$0xff]  ;;  %v1136_v55 = vld [vmem:[#allocation5 + $0x18] sm:$0xff] }
 0xb28   :  { %1470 = vmatmul.mubr.msk.f32.vlgmr.msra.gmra.mrb[6].mxu0 %vm28_vm1, %v663_v62  ;;  %v1940_v62 = vld [vmem:[%s1989_s5] ss:$0 sm:$0xff]  ;;  %s1690_s5 = smov [#allocation6]  }
 0xb29   :  { %1567 = vmatpush3.bf16.msra.mxu0 %v1754_v9  ;;  %1491 = vmatprep.mubr.msk.f32.mxu0 %vm1686_vm2, %v1684_v7  ;;  %v748_v13 = vpop.permute.xlu1 %747  ;;  %s1294_s10 = sshll.u32 %s1690_s5, 4  ;;  %s1295_s10 = int_to_ptr.vmem [resolvable:$true] %s1294_s10 }
 0xb2a   :  { %1568 = vmatprep.subr.bf16.mxu0 %v1685_v11  ;;  %s1660_s11 = scalar_lea.vmem %s1295_s10, 1024  ;;  %p1665_p1 = scmp.lt.s32.totalorder %s1295_s10, %s1295_s10 }
 0xb2b   :  { %p1661_p0 = scmp.ne.s32.totalorder %s1295_s10, %s1660_s11  ;;  %p1666_p2 = scmp.lt.s32.totalorder %s1660_s11, %s1660_s11 }
 0xb2d   :  { %1570 = vmatpush3.bf16.msra.mxu0 %v1778_v16  ;;  %p1667_p3 = por %p1666_p2, %p1665_p1 }
 0xb2e   :  { %1578 = vmatprep.subr.bf16.mxu0 %v1577_v42 }
 0xb2f   :  { %p1668_p4 = pnand %p1667_p3, %p1661_p0 }
 0xbfb   :  { %v734_v0 = vpop.f32.mrb[6].mxu0 }
 0xbfc   :  { %v738_v1 = vadd.f32 %v734_v0, %v160_v63  ;;  %v1471_v2 = vpop.f32.mrb[7].mxu0 }
 0xbfe   :  { %1628 = vtanh.f32 %v738_v1  ;;  %v1323_v4 = vmul.f32 -1.442695, %v738_v1 }
 0xc00   :  { %1630 = vpow2.f32 %v1323_v4 }
 0xc08   :  { %v1629_v3 = vpop.eup %1628 }
 0xc09   :  { %752 = vrot.lane.b32.xlu0 %v1629_v3, %s1687_s21 }
 0xc0a   :  { %v1631_v5 = vpop.eup %1630 }
 0xc0b   :  { %v742_v6 = vadd.f32 1.0, %v1631_v5 }
 0xc0d   :  { %1632 = vrcp.f32 %v742_v6 }
 0xc17   :  { %v1633_v8 = vpop.eup %1632 }
 0xc18   :  { %v750_v14 = vmul.f32 %v1633_v8, %v748_v13 }
 0xc7b   :  { %v753_v10 = vpop.permute.xlu0 %752 }
 0xc7c   :  { %v755_v12 = vmul.f32 %v1633_v8, %v753_v10 }
 0xc7e   :  { %757 = vrot.lane.b32.xlu0 %v755_v12, %s1687_s21 }
 0xcf0   :  { %v758_v20 = vpop.permute.xlu0 %757 }
 0xcf1   :  { %v760_v15 = vadd.f32 %v758_v20, %v750_v14 }
 0xcf3   :  { %1634 = vtanh.f32 %v760_v15 }
 0xcfd   :  { %v1635_v17 = vpop.eup %1634 }
 0xcfe   :  { %763 = vrot.lane.b32.xlu1 %v1635_v17, %s1687_s21 }
 0xd02   :  { %768 = vrot.lane.b32.xlu1 %v760_v15, %s1688_s3 }
 0xd70   :  { %v764_v19 = vpop.permute.xlu1 %763 }
 0xd71   :  { %v766_v21 = vmul.f32 %v1633_v8, %v764_v19 }
 0xd73   :  { %773 = vrot.lane.b32.xlu0 %v766_v21, %s1689_s22 }
 0xd74   :  { %v769_v25 = vpop.permute.xlu1 %768 }
 0xd75   :  { %771 = vst.msk [vmem:[#allocation3] sm:$0xff] %vm28_vm1, %v769_v25 }
 0xd7c   :  { %v782_v26 = vld [vmem:[#allocation3] sm:$0xff] }
 0xd7d   :  { %865 = vrot.lane.b32.xlu1 %v782_v26, %s1687_s21 }
 0xde5   :  { %v774_v27 = vpop.permute.xlu0 %773 }
 0xde6   :  { %776 = vst.msk [vmem:[#allocation2] sm:$0xff] %vm28_vm1, %v774_v27  ;;  %778 = vst.msk [vmem:[#allocation5 + $0x20] sm:$0xff] %vm28_vm1, %v774_v27 }
 0xded   :  { %v781_v28 = vld [vmem:[#allocation2] sm:$0xff]  ;;  %v1137_v56 = vld [vmem:[#allocation5 + $0x20] sm:$0xff] }
 0xdee   :  { %1481 = vmatmul.mubr.msk.f32.vlgmr.msra.gmra.mrb[10].mxu1 %vm28_vm1, %v781_v28 }
 0xdef   :  { %1573 = vmatpush3.bf16.msra.mxu1 %v1754_v9  ;;  %1502 = vmatprep.mubr.msk.f32.mxu1 %vm1686_vm2, %v1684_v7 }
 0xdf0   :  { %1574 = vmatprep.subr.bf16.mxu1 %v1685_v11 }
 0xdf3   :  { %1576 = vmatpush3.bf16.msra.mxu1 %v1778_v16  ;;  %v866_v16 = vpop.permute.xlu1 %865 }
 0xec1   :  { %v852_v30 = vpop.f32.mrb[10].mxu1 }
 0xec2   :  { %v856_v31 = vadd.f32 %v852_v30, %v165_v29  ;;  %v1482_v32 = vpop.f32.mrb[11].mxu1 }
 0xec4   :  { %1636 = vtanh.f32 %v856_v31  ;;  %v1325_v34 = vmul.f32 -1.442695, %v856_v31 }
 0xec6   :  { %1638 = vpow2.f32 %v1325_v34 }
 0xece   :  { %v1637_v33 = vpop.eup %1636 }
 0xecf   :  { %870 = vrot.lane.b32.xlu0 %v1637_v33, %s1687_s21 }
 0xed0   :  { %v1639_v9 = vpop.eup %1638 }
 0xed1   :  { %v860_v35 = vadd.f32 1.0, %v1639_v9 }
 0xed3   :  { %1640 = vrcp.f32 %v860_v35 }
 0xedd   :  { %v1641_v7 = vpop.eup %1640 }
 0xede   :  { %v868_v37 = vmul.f32 %v1641_v7, %v866_v16 }
 0xf41   :  { %v871_v36 = vpop.permute.xlu0 %870 }
 0xf42   :  { %v873_v11 = vmul.f32 %v1641_v7, %v871_v36 }
 0xf44   :  { %875 = vrot.lane.b32.xlu0 %v873_v11, %s1687_s21 }
 0xfb6   :  { %v876_v18 = vpop.permute.xlu0 %875 }
 0xfb7   :  { %v878_v38 = vadd.f32 %v876_v18, %v868_v37 }
 0xfb9   :  { %1642 = vtanh.f32 %v878_v38 }
 0xfc3   :  { %v1643_v39 = vpop.eup %1642 }
 0xfc4   :  { %881 = vrot.lane.b32.xlu1 %v1643_v39, %s1687_s21 }
 0xfc8   :  { %886 = vrot.lane.b32.xlu1 %v878_v38, %s1688_s3 }
0x1036   :  { %v882_v43 = vpop.permute.xlu1 %881 }
0x1037   :  { %v884_v44 = vmul.f32 %v1641_v7, %v882_v43  ;;  %v175_v7 = vadd.f32 %v1806_v23, %v1804_v22 }
0x1039   :  { %891 = vrot.lane.b32.xlu0 %v884_v44, %s1689_s22 }
0x103a   :  { %v887_v45 = vpop.permute.xlu1 %886 }
0x103b   :  { %889 = vst.msk [vmem:[#allocation3] sm:$0xff] %vm28_vm1, %v887_v45 }
0x1042   :  { %v900_v46 = vld [vmem:[#allocation3] sm:$0xff] }
0x1043   :  { %983 = vrot.lane.b32.xlu1 %v900_v46, %s1687_s21 }
0x10ab   :  { %v892_v47 = vpop.permute.xlu0 %891 }
0x10ac   :  { %894 = vst.msk [vmem:[#allocation2] sm:$0xff] %vm28_vm1, %v892_v47  ;;  %896 = vst.msk [vmem:[#allocation5 + $0x28] sm:$0xff] %vm28_vm1, %v892_v47 }
0x10b3   :  { %v899_v51 = vld [vmem:[#allocation2] sm:$0xff]  ;;  %v1138_v57 = vld [vmem:[#allocation5 + $0x28] sm:$0xff] }
0x10b4   :  { %1492 = vmatmul.mubr.msk.f32.vlgmr.msra.gmra.mrb[8].mxu0 %vm28_vm1, %v899_v51 }
0x10b5   :  { %1580 = vmatpush3.bf16.msra.mxu0 %v1577_v42  ;;  %1513 = vmatprep.mubr.msk.f32.mxu0 %vm28_vm1, %v1133_v52  ;;  %v984_v25 = vpop.permute.xlu1 %983 }
0x10b6   :  { %1582 = vmatprep.subr.bf16.mxu0 %v1581_v50 }
0x10b9   :  { %1584 = vmatpush3.bf16.msra.mxu0 %v1581_v50 }
0x10bc   :  { %1514 = vmatmul.mubr.msk.f32.vlgmr.msra.gmra.mrb[10].mxu0 %vm28_vm1, %v1134_v53 }
0x10bd   :  { %1516 = vmatprep.mubr.msk.f32.mxu0 %vm28_vm1, %v1135_v54 }
0x10c0   :  { %1517 = vmatmul.mubr.msk.f32.gmra.mrb[12].mxu0 %vm28_vm1, %v1136_v55 }
0x10c1   :  { %1519 = vmatprep.mubr.msk.f32.mxu0 %vm28_vm1, %v1137_v56 }
0x10c4   :  { %1520 = vmatmul.mubr.msk.f32.gmra.mrb[14].mxu0 %vm28_vm1, %v1138_v57 }
0x1187   :  { %v970_v59 = vpop.f32.mrb[8].mxu0 }
0x1188   :  { %v974_v60 = vadd.f32 %v970_v59, %v170_v58  ;;  %v1493_v61 = vpop.f32.mrb[9].mxu0 }
0x118a   :  { %1644 = vtanh.f32 %v974_v60  ;;  %v1327_v14 = vmul.f32 -1.442695, %v974_v60 }
0x118c   :  { %1646 = vpow2.f32 %v1327_v14 }
0x118f   :  { %v1515_v63 = vpop.f32.mrb[10].mxu0 }
0x1190   :  { %v1248_v0 = vadd.f32 %v1515_v63, %v1940_v62  ;;  %v1242_v1 = vpop.f32.mrb[11].mxu0 }
0x1191   :  { %v1243_v2 = vadd.f32 %v1940_v62, %v1242_v1 }
0x1192   :  { %1282 = vst [vmem:[#allocation6 + $0x8] sm:$0xff] %v1248_v0 }
0x1193   :  { %1281 = vst [vmem:[#allocation6] sm:$0xff] %v1243_v2  ;;  %v1518_v3 = vpop.f32.mrb[12].mxu0 }
0x1194   :  { %v1645_v4 = vpop.eup %1644  ;;  %v1258_v24 = vadd.f32 %v1518_v3, %v1940_v62  ;;  %v1252_v5 = vpop.f32.mrb[13].mxu0 }
0x1195   :  { %v1253_v6 = vadd.f32 %v1940_v62, %v1252_v5  ;;  %988 = vrot.lane.b32.xlu0 %v1645_v4, %s1687_s21 }
0x1196   :  { %1284 = vst [vmem:[#allocation6 + $0x18] sm:$0xff] %v1258_v24  ;;  %v1647_v20 = vpop.eup %1646 }
0x1197   :  { %1283 = vst [vmem:[#allocation6 + $0x10] sm:$0xff] %v1253_v6  ;;  %v1521_v8 = vpop.f32.mrb[14].mxu0  ;;  %v978_v15 = vadd.f32 1.0, %v1647_v20 }
0x1198   :  { %v1268_v10 = vadd.f32 %v1521_v8, %v1940_v62  ;;  %v1262_v12 = vpop.f32.mrb[15].mxu0 }
0x1199   :  { %v1263_v13 = vadd.f32 %v1940_v62, %v1262_v12  ;;  %1648 = vrcp.f32 %v978_v15 }
0x119a   :  { %1286 = vst [vmem:[#allocation6 + $0x28] sm:$0xff] %v1268_v10 }
0x119b   :  { %1285 = vst [vmem:[#allocation6 + $0x20] sm:$0xff] %v1263_v13 }
0x11a3   :  { %v1649_v17 = vpop.eup %1648 }
0x11a4   :  { %v986_v26 = vmul.f32 %v1649_v17, %v984_v25 }
0x1207   :  { %v989_v19 = vpop.permute.xlu0 %988 }
0x1208   :  { %v991_v21 = vmul.f32 %v1649_v17, %v989_v19 }
0x120a   :  { %993 = vrot.lane.b32.xlu0 %v991_v21, %s1687_s21 }
0x127c   :  { %v994_v27 = vpop.permute.xlu0 %993 }
0x127d   :  { %v996_v28 = vadd.f32 %v994_v27, %v986_v26 }
0x127f   :  { %1650 = vtanh.f32 %v996_v28 }
0x1289   :  { %v1651_v29 = vpop.eup %1650 }
0x128a   :  { %999 = vrot.lane.b32.xlu1 %v1651_v29, %s1687_s21 }
0x128e   :  { %1004 = vrot.lane.b32.xlu1 %v996_v28, %s1688_s3 }
0x12fc   :  { %v1000_v30 = vpop.permute.xlu1 %999 }
0x12fd   :  { %v1002_v31 = vmul.f32 %v1649_v17, %v1000_v30 }
0x12ff   :  { %1009 = vrot.lane.b32.xlu0 %v1002_v31, %s1689_s22 }
0x1300   :  { %v1005_v32 = vpop.permute.xlu1 %1004 }
0x1301   :  { %1007 = vst.msk [vmem:[#allocation3] sm:$0xff] %vm28_vm1, %v1005_v32 }
0x1308   :  { %v1018_v33 = vld [vmem:[#allocation3] sm:$0xff] }
0x1309   :  { %1101 = vrot.lane.b32.xlu1 %v1018_v33, %s1687_s21 }
0x1371   :  { %v1010_v34 = vpop.permute.xlu0 %1009 }
0x1372   :  { %1012 = vst.msk [vmem:[#allocation2] sm:$0xff] %vm28_vm1, %v1010_v34  ;;  %1014 = vst.msk [vmem:[#allocation5 + $0x30] sm:$0xff] %vm28_vm1, %v1010_v34 }
0x1379   :  { %v1017_v9 = vld [vmem:[#allocation2] sm:$0xff] }
0x137a   :  { %v1139_v35 = vld [vmem:[#allocation5 + $0x30] sm:$0xff]  ;;  %1503 = vmatmul.mubr.msk.f32.vlgmr.msra.gmra.mrb[12].mxu1 %vm28_vm1, %v1017_v9 }
0x137b   :  { %1522 = vmatprep.mubr.msk.f32.mxu0 %vm28_vm1, %v1139_v35  ;;  %v1102_v43 = vpop.permute.xlu1 %1101 }
0x144d   :  { %v1088_v36 = vpop.f32.mrb[12].mxu1 }
0x144e   :  { %v1092_v11 = vadd.f32 %v1088_v36, %v175_v7  ;;  %v1504_v16 = vpop.f32.mrb[13].mxu1 }
0x1450   :  { %1652 = vtanh.f32 %v1092_v11  ;;  %v1329_v18 = vmul.f32 -1.442695, %v1092_v11 }
0x1452   :  { %1654 = vpow2.f32 %v1329_v18 }
0x145a   :  { %v1653_v37 = vpop.eup %1652 }
0x145b   :  { %1106 = vrot.lane.b32.xlu0 %v1653_v37, %s1687_s21 }
0x145c   :  { %v1655_v38 = vpop.eup %1654 }
0x145d   :  { %v1096_v39 = vadd.f32 1.0, %v1655_v38 }
0x145f   :  { %1656 = vrcp.f32 %v1096_v39 }
0x1469   :  { %v1657_v40 = vpop.eup %1656 }
0x146a   :  { %v1104_v44 = vmul.f32 %v1657_v40, %v1102_v43 }
0x14cd   :  { %v1107_v41 = vpop.permute.xlu0 %1106 }
0x14ce   :  { %v1109_v42 = vmul.f32 %v1657_v40, %v1107_v41 }
0x14d0   :  { %1111 = vrot.lane.b32.xlu0 %v1109_v42, %s1687_s21 }
0x1542   :  { %v1112_v22 = vpop.permute.xlu0 %1111 }
0x1543   :  { %v1114_v23 = vadd.f32 %v1112_v22, %v1104_v44 }
0x1545   :  { %1658 = vtanh.f32 %v1114_v23 }
0x154f   :  { %v1659_v45 = vpop.eup %1658 }
0x1550   :  { %1117 = vrot.lane.b32.xlu1 %v1659_v45, %s1687_s21 }
0x1554   :  { %1122 = vrot.lane.b32.xlu1 %v1114_v23, %s1688_s3 }
0x15c2   :  { %v1118_v46 = vpop.permute.xlu1 %1117 }
0x15c3   :  { %v1120_v47 = vmul.f32 %v1657_v40, %v1118_v46 }
0x15c5   :  { %1127 = vrot.lane.b32.xlu0 %v1120_v47, %s1689_s22 }
0x15c6   :  { %v1123_v48 = vpop.permute.xlu1 %1122 }
0x15c7   :  { %1125 = vst.msk [vmem:[#allocation3] sm:$0xff] %vm28_vm1, %v1123_v48 }
0x1637   :  { %v1128_v49 = vpop.permute.xlu0 %1127 }
0x1638   :  { %1130 = vst.msk [vmem:[#allocation2] sm:$0xff] %vm28_vm1, %v1128_v49  ;;  %1132 = vst.msk [vmem:[#allocation5 + $0x38] sm:$0xff] %vm28_vm1, %v1128_v49 }
0x163f   :  { %v1140_v50 = vld [vmem:[#allocation5 + $0x38] sm:$0xff] }
0x1640   :  { %1523 = vmatmul.mubr.msk.f32.gmra.mrb[16].mxu0 %vm28_vm1, %v1140_v50 }
0x1713   :  { %v1524_v51 = vpop.f32.mrb[16].mxu0 }
0x1714   :  { %v1278_v52 = vadd.f32 %v1524_v51, %v1940_v62  ;;  %v1272_v53 = vpop.f32.mrb[17].mxu0 }
0x1715   :  { %v1273_v54 = vadd.f32 %v1940_v62, %v1272_v53 }
0x1716   :  { %1288 = vst [vmem:[#allocation6 + $0x38] sm:$0xff] %v1278_v52 }
0x1717   :  { %1287 = vst [vmem:[#allocation6 + $0x30] sm:$0xff] %v1273_v54 }
0x1718   :  { %1671 = shalt.err (!%p1668_p4)
}
0x1719   :  { %s1672_s14 = scalar_lea.hbm %s1990_s6, 1024 }
0x171a   :  { %p1673_p5 = scmp.ne.s32.totalorder %s1990_s6, %s1672_s14  ;;  %p1676_p6 = scmp.lt.u32.totalorder %s1672_s14, %s1990_s6 }
0x171c   :  { %p1678_p7 = pnand %p1676_p6, %p1673_p5 }
0x171e   :  { %1681 = shalt.err (!%p1678_p7)
}
0x171f   :  { %s1691_s19 = smov 128   ;;  %s1692_s2 = smov 8  }
0x1720   :  { %1300 = dma.vmem_to_hbm [thread:$0]  %s1295_s10, 1024, %s1990_s6, [#allocation7], %s1691_s19, %s1691_s19, %s1692_s2  }
0x1721   :  { %1682 = dma.done.wait [#allocation7], 1024  }
0x1722   :  { %1683 = vsyncadd [#allocation7], 4294966272 }
0x1723   :  { %1304 = vsyncpa [#allocation7], 1 }

</bundles_post_ra>
